<compile_context>
chip_gen: v7x
topology: tpu7x:2x2x1
jax: 0.10.0
libtpu: 0.0.40
codegen_flags: <defaults>
</compile_context>

<pallas_src>
import functools
import math

import jax
import jax.numpy as jnp
from jax import lax
from jax.experimental import pallas as pl
from jax.experimental.pallas import tpu as pltpu


# ----------------------------------------------------------------------------
# Fused kernel.  Per grid step it processes TB batch elements laid out as a
# lane-dense (TB, C, H*W) block and applies the three gates in place.
#
# Operands (in order):
#   cmix_ref  SMEM (2,)        : [0.5+sig(mix_c[0]), 0.5+sig(mix_c[1])]
#   x_ref     VMEM (TB, C, HW) : input block (native dtype)
#   red_ref   VMEM (HW, H+W)   : [eh^T | ew^T] one-hot reduce matrix   (resident)
#   exp_ref   VMEM (H+W, HW)   : [eh ; ew]    one-hot expand matrix    (resident)
#   bdhw_ref  VMEM (H+W, H+W)  : block-diag band matrix for the h/w tap convs (resident)
#   bdc_ref   VMEM (C, C)      : band matrix for the channel tap conv  (resident)
#   rowp_ref  VMEM (5, H+W)    : per-position rows [a0, a1, 1/n, 1/(n-1), n/(n-1)]
#   o_ref     VMEM (TB, C, HW) : output block (native dtype)
# ----------------------------------------------------------------------------
def _mca_kernel(cmix_ref, x_ref, red_ref, exp_ref, bdhw_ref, bdc_ref, rowp_ref, o_ref,
                *, C, H, W, TB):
    HW = H * W
    inv_hw = 1.0 / float(HW)
    inv_hwm1 = 1.0 / float(HW - 1)
    hw_rat = float(HW) / float(HW - 1)
    inv_chw = 1.0 / float(C * HW)
    third = 1.0 / 3.0
    hi = jax.lax.Precision.HIGHEST   # exact f32 MXU path (one-hot sums / tap convs)

    # Resident constants (DMA'd once: block index is the same every grid step).
    red_mat = red_ref[...]            # (HW, H+W)
    exp_mat = exp_ref[...]            # (H+W, HW)
    bd_hw = bdhw_ref[...]             # (H+W, H+W)
    bd_c = bdc_ref[...]               # (C, C)
    rp = rowp_ref[...]                # (5, H+W)
    a0_row, a1_row = rp[0:1, :], rp[1:2, :]
    invn_row, invnm1_row, rat_row = rp[2:3, :], rp[3:4, :], rp[4:5, :]
    a0_c = cmix_ref[0]
    a1_c = cmix_ref[1]

    # Short static unroll over the batch elements folded into this block.
    for tb in range(TB):
        xf = x_ref[tb].astype(jnp.float32)                         # (C, HW)

        # ---- global scalar centering: std is shift-invariant, avoids cancellation ----
        s1_raw = jnp.sum(xf, axis=1, keepdims=True)                # (C, 1)
        gmean = jnp.sum(s1_raw, axis=0, keepdims=True) * inv_chw   # (1, 1)
        xc = xf - gmean
        # TODO(synk): for very large C*H*W (v7x 64 MiB VMEM), chunk the HW reductions in a
        # fori_loop so xsq is never a full-block live temporary (two-pass stats/apply split).
        xsq = xc * xc

        # ---- channel gate (stats over HW, per channel; lane reductions) ----
        s1_c = s1_raw - gmean * float(HW)                          # centered sums (C, 1)
        s2_c = jnp.sum(xsq, axis=1, keepdims=True)                 # (C, 1)
        mu_c = s1_c * inv_hw
        mean_c = mu_c + gmean
        var_c = s2_c * inv_hwm1 - (mu_c * mu_c) * hw_rat
        std_c = jnp.sqrt(jnp.maximum(var_c, 0.0))
        pre_c = a0_c * mean_c + a1_c * std_c                       # (C, 1)
        g_c = jax.nn.sigmoid(
            jnp.dot(bd_c, pre_c, preferred_element_type=jnp.float32, precision=hi)
        ) * third                                                  # (C, 1), pre-scaled

        # ---- spatial gates: sublane reduce over C, then one-hot MXU reduce over lanes ----
        r1 = jnp.sum(xc, axis=0, keepdims=True)                    # (1, HW)
        r2 = jnp.sum(xsq, axis=0, keepdims=True)                   # (1, HW)
        sum_row = jnp.dot(r1, red_mat, preferred_element_type=jnp.float32, precision=hi)
        ssq_row = jnp.dot(r2, red_mat, preferred_element_type=jnp.float32, precision=hi)
        mu_row = sum_row * invn_row                                # (1, H+W)
        mean_row = mu_row + gmean
        var_row = ssq_row * invnm1_row - (mu_row * mu_row) * rat_row
        std_row = jnp.sqrt(jnp.maximum(var_row, 0.0))
        pre_row = a0_row * mean_row + a1_row * std_row             # (1, H+W)
        g_row = jax.nn.sigmoid(
            jnp.dot(pre_row, bd_hw, preferred_element_type=jnp.float32, precision=hi)
        ) * third                                                  # (1, H+W), pre-scaled
        g_hw = jnp.dot(g_row, exp_mat,
                       preferred_element_type=jnp.float32, precision=hi)   # (1, HW)

        # ---- fused apply: x * (g_c/3 + (g_h+g_w)/3) — two full-block VPU ops ----
        o_ref[tb] = (xf * (g_c + g_hw)).astype(o_ref.dtype)


def _band(taps, n):
    """(n, n) banded 'same'-conv matrix, left-mul orientation: (band @ col)[m] = sum_j taps[j]*col[m+j-p]."""
    k = taps.shape[0]
    p = (k - 1) // 2
    r = jnp.arange(n, dtype=jnp.int32)[:, None]
    c = jnp.arange(n, dtype=jnp.int32)[None, :]
    d = c - r + p
    m = jnp.zeros((n, n), jnp.float32)
    for j in range(k):                       # k is tiny (typically 3); static unroll
        m = m + jnp.where(d == j, taps[j], 0.0)
    return m


def _pick_batch_tile(b, per_batch_bytes, target_bytes=4 << 20):
    """Largest divisor of b with block <= target, keeping >= 2 grid steps when b >= 2."""
    best = 1
    for tb in range(1, b + 1):
        if b % tb:
            continue
        if b // tb < min(b, 2):              # keep megacore sharding alive on v7x
            break
        if tb > 1 and tb * per_batch_bytes > target_bytes:
            break
        best = tb
    return best


def mca_layer(x, params):
    b, c, h, w = x.shape
    hw = h * w
    hp = h + w
    f32 = jnp.float32
    assert hw > 1 and c * w > 1 and c * h > 1, "unbiased std needs >= 2 elements per group"
    # TODO(synk): for spatial sizes where H*W is not a multiple of 128 (e.g. 14x14), pad HW
    # in the wrapper (and mask the stats) so the final store stays an unmasked lane-dense vst.

    conv_h = params["conv_h"].astype(f32)
    conv_w = params["conv_w"].astype(f32)
    conv_c = params["conv_c"].astype(f32)

    # ---- grid-invariant constants, built once per call (tiny XLA ops) ----
    ii = jnp.arange(hw, dtype=jnp.int32)
    eh = (ii[None, :] // w == jnp.arange(h, dtype=jnp.int32)[:, None]).astype(f32)  # (H, HW)
    ew = (ii[None, :] % w == jnp.arange(w, dtype=jnp.int32)[:, None]).astype(f32)   # (W, HW)
    exp_mat = jnp.concatenate([eh, ew], axis=0)       # (H+W, HW)
    red_mat = exp_mat.T                               # (HW, H+W)

    bd_c = _band(conv_c, c)                           # (C, C), left-mul
    bd_hw = jnp.zeros((hp, hp), f32)                  # block-diag, right-mul orientation
    bd_hw = bd_hw.at[:h, :h].set(_band(conv_h, h).T)
    bd_hw = bd_hw.at[h:, h:].set(_band(conv_w, w).T)

    sh = jax.nn.sigmoid(params["mix_h"].astype(f32))
    sw = jax.nn.sigmoid(params["mix_w"].astype(f32))
    sc = jax.nn.sigmoid(params["mix_c"].astype(f32))

    def hw_row(vh, vw):
        return jnp.concatenate([jnp.full((h,), vh, f32), jnp.full((w,), vw, f32)])

    n_h, n_w = float(c * w), float(c * h)
    rowp = jnp.stack([
        hw_row(0.5 + sh[0], 0.5 + sw[0]),             # avg coefficient
        hw_row(0.5 + sh[1], 0.5 + sw[1]),             # std coefficient
        hw_row(1.0 / n_h, 1.0 / n_w),                 # 1/n
        hw_row(1.0 / (n_h - 1.0), 1.0 / (n_w - 1.0)), # 1/(n-1)
        hw_row(n_h / (n_h - 1.0), n_w / (n_w - 1.0)), # n/(n-1)
    ], axis=0)                                        # (5, H+W)
    cmix = jnp.stack([0.5 + sc[0], 0.5 + sc[1]])      # (2,) SMEM scalars

    # ---- tiling: fold batch elements into one grid step; lane-dense (C, HW) blocks ----
    x_flat = x.reshape(b, c, hw)                      # free contiguous reshape, native dtype
    itemsize = x.dtype.itemsize
    tb = _pick_batch_tile(b, c * hw * itemsize)
    grid = (b // tb,)

    blk_io = tb * c * hw * itemsize
    blk_f32 = tb * c * hw * 4
    const_bytes = (hw * hp * 2 + hp * hp + c * c + 5 * hp + 2) * 4
    vmem_limit = int(min(48 * 2 ** 20,
                         max(32 * 2 ** 20, 4 * blk_io + 6 * blk_f32 + const_bytes + (1 << 20))))

    kernel = functools.partial(_mca_kernel, C=c, H=h, W=w, TB=tb)

    out = pl.pallas_call(
        kernel,
        grid=grid,
        in_specs=[
            pl.BlockSpec(memory_space=pltpu.MemorySpace.SMEM),          # cmix (2,)
            pl.BlockSpec((tb, c, hw), lambda i: (i, 0, 0)),             # x block
            pl.BlockSpec((hw, hp), lambda i: (0, 0)),                   # red_mat (resident)
            pl.BlockSpec((hp, hw), lambda i: (0, 0)),                   # exp_mat (resident)
            pl.BlockSpec((hp, hp), lambda i: (0, 0)),                   # bd_hw   (resident)
            pl.BlockSpec((c, c), lambda i: (0, 0)),                     # bd_c    (resident)
            pl.BlockSpec((5, hp), lambda i: (0, 0)),                    # rowp    (resident)
        ],
        out_specs=pl.BlockSpec((tb, c, hw), lambda i: (i, 0, 0)),
        out_shape=jax.ShapeDtypeStruct((b, c, hw), x.dtype),
        compiler_params=pltpu.CompilerParams(
            dimension_semantics=("parallel",),
            vmem_limit_bytes=vmem_limit),
    )(cmix, x_flat, red_mat, exp_mat, bd_hw, bd_c, rowp)
    return out.reshape(b, c, h, w)


# ----------------------------------------------------------------------------
# Pure-JAX reference (mirrors the PyTorch forward exactly), for a sanity check.
# ----------------------------------------------------------------------------
def mca_ref(x, params):
    b, c, h, w = x.shape
    x = x.astype(jnp.float32)

    def gate(v, mix, conv_w):
        # v: (B, C', N) -> gate (B, C')
        n = v.shape[2]
        mean = jnp.mean(v, axis=2)
        std = jnp.sqrt(jnp.sum((v - mean[..., None]) ** 2, axis=2) / (n - 1))  # unbiased (torch.std)
        s = jax.nn.sigmoid(mix)
        pre = 0.5 * (mean + std) + s[0] * mean + s[1] * std
        k = conv_w.shape[0]
        p = (k - 1) // 2
        prep = jnp.pad(pre, ((0, 0), (p, p)))
        out = sum(conv_w[j] * prep[:, j:j + pre.shape[1]] for j in range(k))
        return jax.nn.sigmoid(out)

    g_h = gate(x.transpose(0, 2, 1, 3).reshape(b, h, c * w), params["mix_h"], params["conv_h"])
    g_w = gate(x.transpose(0, 3, 2, 1).reshape(b, w, h * c), params["mix_w"], params["conv_w"])
    g_c = gate(x.reshape(b, c, h * w), params["mix_c"], params["conv_c"])
    return x * (g_c[:, :, None, None] + g_h[:, None, :, None] + g_w[:, None, None, :]) / 3.0


if __name__ == "__main__":
    b, c, h, w = 2, 32, 16, 16

    # MCALayer kernel-size rule for the channel gate (c_hw); c=32 -> 3.
    temp = round(abs((math.log2(c) - 1) / 1.5))
    kc_size = temp if temp % 2 else temp - 1
    kc_size = max(kc_size, 1)

    key = jax.random.PRNGKey(0)
    kx, kmh, kmw, kmc, kch, kcw, kcc = jax.random.split(key, 7)
    params = {
        # nn.Parameter(torch.rand(2)) per gate
        "mix_h": jax.random.uniform(kmh, (2,), jnp.float32),
        "mix_w": jax.random.uniform(kmw, (2,), jnp.float32),
        "mix_c": jax.random.uniform(kmc, (2,), jnp.float32),
        # Conv2d(1, 1, (1, k), bias=False) weights per gate (deterministic synthetic init)
        "conv_h": jax.random.normal(kch, (3,), jnp.float32) * 0.5,
        "conv_w": jax.random.normal(kcw, (3,), jnp.float32) * 0.5,
        "conv_c": jax.random.normal(kcc, (kc_size,), jnp.float32) * 0.5,
    }
    x = jax.random.normal(kx, (b, c, h, w), jnp.float32)

    out = jax.block_until_ready(mca_layer(x, params))
    ref = mca_ref(x, params)

    assert out.shape == x.shape
    err = float(jnp.max(jnp.abs(out.astype(jnp.float32) - ref)))
    assert jnp.allclose(out.astype(jnp.float32), ref, atol=1e-4, rtol=1e-4), f"max abs err = {err}"
    print("KERNEL_OK")
</pallas_src>

<mosaic_0001>
module attributes {stable_mosaic.version = 11 : i64} {
  func.func @_mca_kernel(%arg0: i32, %arg1: memref<2xf32, #tpu.memory_space<smem>>, %arg2: memref<1x32x256xf32, #tpu.memory_space<vmem>>, %arg3: memref<256x32xf32, #tpu.memory_space<vmem>>, %arg4: memref<32x256xf32, #tpu.memory_space<vmem>>, %arg5: memref<32x32xf32, #tpu.memory_space<vmem>>, %arg6: memref<32x32xf32, #tpu.memory_space<vmem>>, %arg7: memref<5x32xf32, #tpu.memory_space<vmem>>, %arg8: memref<1x32x256xf32, #tpu.memory_space<vmem>>) attributes {dimension_semantics = [#tpu.dimension_semantics<parallel>], iteration_bounds = array<i64: 2>, scalar_prefetch = 0 : i64, scratch_operands = 0 : i64, tpu.core_type = #tpu.core_type<tc>, window_params = [{transform_indices = @transform_0, window_bounds = array<i64: 2>}, {transform_indices = @transform_1, window_bounds = array<i64: 1, 32, 256>}, {pipeline_mode = #tpu.pipeline_mode<synchronous>, transform_indices = @transform_2, window_bounds = array<i64: 256, 32>}, {pipeline_mode = #tpu.pipeline_mode<synchronous>, transform_indices = @transform_3, window_bounds = array<i64: 32, 256>}, {pipeline_mode = #tpu.pipeline_mode<synchronous>, transform_indices = @transform_4, window_bounds = array<i64: 32, 32>}, {pipeline_mode = #tpu.pipeline_mode<synchronous>, transform_indices = @transform_5, window_bounds = array<i64: 32, 32>}, {pipeline_mode = #tpu.pipeline_mode<synchronous>, transform_indices = @transform_6, window_bounds = array<i64: 5, 32>}, {transform_indices = @transform_7, window_bounds = array<i64: 1, 32, 256>}]} {
    %c0 = arith.constant 0 : index
    %c0_0 = arith.constant 0 : index
    %0 = vector.load %arg3[%c0, %c0_0] : memref<256x32xf32, #tpu.memory_space<vmem>>, vector<256x32xf32>
    %c0_1 = arith.constant 0 : index
    %c0_2 = arith.constant 0 : index
    %1 = vector.load %arg4[%c0_1, %c0_2] : memref<32x256xf32, #tpu.memory_space<vmem>>, vector<32x256xf32>
    %c0_3 = arith.constant 0 : index
    %c0_4 = arith.constant 0 : index
    %2 = vector.load %arg5[%c0_3, %c0_4] : memref<32x32xf32, #tpu.memory_space<vmem>>, vector<32x32xf32>
    %c0_5 = arith.constant 0 : index
    %c0_6 = arith.constant 0 : index
    %3 = vector.load %arg6[%c0_5, %c0_6] : memref<32x32xf32, #tpu.memory_space<vmem>>, vector<32x32xf32>
    %c0_7 = arith.constant 0 : index
    %c0_8 = arith.constant 0 : index
    %4 = vector.load %arg7[%c0_7, %c0_8] : memref<5x32xf32, #tpu.memory_space<vmem>>, vector<5x32xf32>
    %5 = vector.extract_strided_slice %4 {offsets = [0, 0], sizes = [1, 32], strides = [1, 1]} : vector<5x32xf32> to vector<1x32xf32>
    %6 = vector.extract_strided_slice %4 {offsets = [1, 0], sizes = [1, 32], strides = [1, 1]} : vector<5x32xf32> to vector<1x32xf32>
    %7 = vector.extract_strided_slice %4 {offsets = [2, 0], sizes = [1, 32], strides = [1, 1]} : vector<5x32xf32> to vector<1x32xf32>
    %8 = vector.extract_strided_slice %4 {offsets = [3, 0], sizes = [1, 32], strides = [1, 1]} : vector<5x32xf32> to vector<1x32xf32>
    %9 = vector.extract_strided_slice %4 {offsets = [4, 0], sizes = [1, 32], strides = [1, 1]} : vector<5x32xf32> to vector<1x32xf32>
    %c0_9 = arith.constant 0 : index
    %10 = memref.load %arg1[%c0_9] : memref<2xf32, #tpu.memory_space<smem>>
    %c1 = arith.constant 1 : index
    %11 = memref.load %arg1[%c1] : memref<2xf32, #tpu.memory_space<smem>>
    %c0_10 = arith.constant 0 : index
    %c0_11 = arith.constant 0 : index
    %c0_12 = arith.constant 0 : index
    %12 = vector.load %arg2[%c0_10, %c0_11, %c0_12] : memref<1x32x256xf32, #tpu.memory_space<vmem>>, vector<1x32x256xf32>
    %13 = vector.shape_cast %12 : vector<1x32x256xf32> to vector<32x256xf32>
    %cst = arith.constant dense<0.000000e+00> : vector<32xf32>
    %14 = vector.multi_reduction <add>, %13, %cst [1] : vector<32x256xf32> to vector<32xf32>
    %15 = vector.shape_cast %14 : vector<32xf32> to vector<32x1xf32>
    %cst_13 = arith.constant dense<0.000000e+00> : vector<1xf32>
    %16 = vector.multi_reduction <add>, %15, %cst_13 [0] : vector<32x1xf32> to vector<1xf32>
    %17 = vector.shape_cast %16 : vector<1xf32> to vector<1x1xf32>
    %cst_14 = arith.constant 1.22070313E-4 : f32
    %18 = vector.broadcast %cst_14 : f32 to vector<1x1xf32>
    %19 = arith.mulf %17, %18 : vector<1x1xf32>
    %20 = vector.broadcast %19 : vector<1x1xf32> to vector<32x256xf32>
    %21 = arith.subf %13, %20 : vector<32x256xf32>
    %22 = arith.mulf %21, %21 : vector<32x256xf32>
    %cst_15 = arith.constant 2.560000e+02 : f32
    %23 = vector.broadcast %cst_15 : f32 to vector<1x1xf32>
    %24 = arith.mulf %19, %23 : vector<1x1xf32>
    %25 = vector.broadcast %24 : vector<1x1xf32> to vector<32x1xf32>
    %26 = arith.subf %15, %25 : vector<32x1xf32>
    %cst_16 = arith.constant dense<0.000000e+00> : vector<32xf32>
    %27 = vector.multi_reduction <add>, %22, %cst_16 [1] : vector<32x256xf32> to vector<32xf32>
    %28 = vector.shape_cast %27 : vector<32xf32> to vector<32x1xf32>
    %cst_17 = arith.constant 3.906250e-03 : f32
    %29 = vector.broadcast %cst_17 : f32 to vector<32x1xf32>
    %30 = arith.mulf %26, %29 : vector<32x1xf32>
    %31 = vector.broadcast %19 : vector<1x1xf32> to vector<32x1xf32>
    %32 = arith.addf %30, %31 : vector<32x1xf32>
    %cst_18 = arith.constant 0.00392156886 : f32
    %33 = vector.broadcast %cst_18 : f32 to vector<32x1xf32>
    %34 = arith.mulf %28, %33 : vector<32x1xf32>
    %35 = arith.mulf %30, %30 : vector<32x1xf32>
    %cst_19 = arith.constant 1.00392163 : f32
    %36 = vector.broadcast %cst_19 : f32 to vector<32x1xf32>
    %37 = arith.mulf %35, %36 : vector<32x1xf32>
    %38 = arith.subf %34, %37 : vector<32x1xf32>
    %cst_20 = arith.constant 0.000000e+00 : f32
    %39 = vector.broadcast %cst_20 : f32 to vector<32x1xf32>
    %40 = arith.maximumf %38, %39 : vector<32x1xf32>
    %41 = math.sqrt %40 : vector<32x1xf32>
    %42 = vector.broadcast %10 : f32 to vector<32x1xf32>
    %43 = arith.mulf %42, %32 : vector<32x1xf32>
    %44 = vector.broadcast %11 : f32 to vector<32x1xf32>
    %45 = arith.mulf %44, %41 : vector<32x1xf32>
    %46 = arith.addf %43, %45 : vector<32x1xf32>
    %cst_21 = arith.constant dense<0.000000e+00> : vector<32x1xf32>
    %47 = tpu.matmul %3, %46, %cst_21 {dimension_numbers = #tpu.dot_dimension_numbers<[1], [0], [0], [1], [0, 0, 1, 1], [], []>, precision = #tpu.contract_precision<fp32>} : vector<32x32xf32>, vector<32x1xf32>, vector<32x1xf32> -> vector<32x1xf32>
    %48 = arith.negf %47 : vector<32x1xf32>
    %49 = math.exp %48 : vector<32x1xf32>
    %cst_22 = arith.constant 1.000000e+00 : f32
    %50 = vector.broadcast %cst_22 : f32 to vector<32x1xf32>
    %51 = arith.addf %50, %49 : vector<32x1xf32>
    %52 = arith.divf %50, %51 : vector<32x1xf32>
    %cst_23 = arith.constant 0.333333343 : f32
    %53 = vector.broadcast %cst_23 : f32 to vector<32x1xf32>
    %54 = arith.mulf %52, %53 : vector<32x1xf32>
    %cst_24 = arith.constant dense<0.000000e+00> : vector<256xf32>
    %55 = vector.multi_reduction <add>, %21, %cst_24 [0] : vector<32x256xf32> to vector<256xf32>
    %56 = vector.shape_cast %55 : vector<256xf32> to vector<1x256xf32>
    %cst_25 = arith.constant dense<0.000000e+00> : vector<256xf32>
    %57 = vector.multi_reduction <add>, %22, %cst_25 [0] : vector<32x256xf32> to vector<256xf32>
    %58 = vector.shape_cast %57 : vector<256xf32> to vector<1x256xf32>
    %cst_26 = arith.constant dense<0.000000e+00> : vector<1x32xf32>
    %59 = tpu.matmul %56, %0, %cst_26 {dimension_numbers = #tpu.dot_dimension_numbers<[1], [0], [0], [1], [0, 0, 1, 1], [], []>, precision = #tpu.contract_precision<fp32>} : vector<1x256xf32>, vector<256x32xf32>, vector<1x32xf32> -> vector<1x32xf32>
    %cst_27 = arith.constant dense<0.000000e+00> : vector<1x32xf32>
    %60 = tpu.matmul %58, %0, %cst_27 {dimension_numbers = #tpu.dot_dimension_numbers<[1], [0], [0], [1], [0, 0, 1, 1], [], []>, precision = #tpu.contract_precision<fp32>} : vector<1x256xf32>, vector<256x32xf32>, vector<1x32xf32> -> vector<1x32xf32>
    %61 = arith.mulf %59, %7 : vector<1x32xf32>
    %62 = vector.broadcast %19 : vector<1x1xf32> to vector<1x32xf32>
    %63 = arith.addf %61, %62 : vector<1x32xf32>
    %64 = arith.mulf %60, %8 : vector<1x32xf32>
    %65 = arith.mulf %61, %61 : vector<1x32xf32>
    %66 = arith.mulf %65, %9 : vector<1x32xf32>
    %67 = arith.subf %64, %66 : vector<1x32xf32>
    %cst_28 = arith.constant 0.000000e+00 : f32
    %68 = vector.broadcast %cst_28 : f32 to vector<1x32xf32>
    %69 = arith.maximumf %67, %68 : vector<1x32xf32>
    %70 = math.sqrt %69 : vector<1x32xf32>
    %71 = arith.mulf %5, %63 : vector<1x32xf32>
    %72 = arith.mulf %6, %70 : vector<1x32xf32>
    %73 = arith.addf %71, %72 : vector<1x32xf32>
    %cst_29 = arith.constant dense<0.000000e+00> : vector<1x32xf32>
    %74 = tpu.matmul %73, %2, %cst_29 {dimension_numbers = #tpu.dot_dimension_numbers<[1], [0], [0], [1], [0, 0, 1, 1], [], []>, precision = #tpu.contract_precision<fp32>} : vector<1x32xf32>, vector<32x32xf32>, vector<1x32xf32> -> vector<1x32xf32>
    %75 = arith.negf %74 : vector<1x32xf32>
    %76 = math.exp %75 : vector<1x32xf32>
    %cst_30 = arith.constant 1.000000e+00 : f32
    %77 = vector.broadcast %cst_30 : f32 to vector<1x32xf32>
    %78 = arith.addf %77, %76 : vector<1x32xf32>
    %79 = arith.divf %77, %78 : vector<1x32xf32>
    %cst_31 = arith.constant 0.333333343 : f32
    %80 = vector.broadcast %cst_31 : f32 to vector<1x32xf32>
    %81 = arith.mulf %79, %80 : vector<1x32xf32>
    %cst_32 = arith.constant dense<0.000000e+00> : vector<1x256xf32>
    %82 = tpu.matmul %81, %1, %cst_32 {dimension_numbers = #tpu.dot_dimension_numbers<[1], [0], [0], [1], [0, 0, 1, 1], [], []>, precision = #tpu.contract_precision<fp32>} : vector<1x32xf32>, vector<32x256xf32>, vector<1x256xf32> -> vector<1x256xf32>
    %83 = vector.broadcast %54 : vector<32x1xf32> to vector<32x256xf32>
    %84 = vector.broadcast %82 : vector<1x256xf32> to vector<32x256xf32>
    %85 = arith.addf %83, %84 : vector<32x256xf32>
    %86 = arith.mulf %13, %85 : vector<32x256xf32>
    %c0_33 = arith.constant 0 : index
    %c0_34 = arith.constant 0 : index
    %c0_35 = arith.constant 0 : index
    %87 = vector.load %arg8[%c0_33, %c0_34, %c0_35] : memref<1x32x256xf32, #tpu.memory_space<vmem>>, vector<1x32x256xf32>
    %88 = vector.shape_cast %87 : vector<1x32x256xf32> to vector<32x256xf32>
    %89 = vector.shape_cast %86 : vector<32x256xf32> to vector<1x32x256xf32>
    tpu.vector_store %arg8[%c0_33, %c0_34, %c0_35], %89 {strides = array<i32>} : memref<1x32x256xf32, #tpu.memory_space<vmem>>, vector<1x32x256xf32>,
    return
  }
  func.func @transform_0(%arg0: i32) -> i32 {
    %c0_i32 = arith.constant 0 : i32
    %c0_i32_0 = arith.constant 0 : i32
    return %c0_i32 : i32
  }
  func.func @transform_1(%arg0: i32) -> (i32, i32, i32) {
    %c0_i32 = arith.constant 0 : i32
    %c0_i32_0 = arith.constant 0 : i32
    %c0_i32_1 = arith.constant 0 : i32
    return %arg0, %c0_i32, %c0_i32_0 : i32, i32, i32
  }
  func.func @transform_2(%arg0: i32) -> (i32, i32) {
    %c0_i32 = arith.constant 0 : i32
    %c0_i32_0 = arith.constant 0 : i32
    %c0_i32_1 = arith.constant 0 : i32
    return %c0_i32, %c0_i32_0 : i32, i32
  }
  func.func @transform_3(%arg0: i32) -> (i32, i32) {
    %c0_i32 = arith.constant 0 : i32
    %c0_i32_0 = arith.constant 0 : i32
    %c0_i32_1 = arith.constant 0 : i32
    return %c0_i32, %c0_i32_0 : i32, i32
  }
  func.func @transform_4(%arg0: i32) -> (i32, i32) {
    %c0_i32 = arith.constant 0 : i32
    %c0_i32_0 = arith.constant 0 : i32
    %c0_i32_1 = arith.constant 0 : i32
    return %c0_i32, %c0_i32_0 : i32, i32
  }
  func.func @transform_5(%arg0: i32) -> (i32, i32) {
    %c0_i32 = arith.constant 0 : i32
    %c0_i32_0 = arith.constant 0 : i32
    %c0_i32_1 = arith.constant 0 : i32
    return %c0_i32, %c0_i32_0 : i32, i32
  }
  func.func @transform_6(%arg0: i32) -> (i32, i32) {
    %c0_i32 = arith.constant 0 : i32
    %c0_i32_0 = arith.constant 0 : i32
    %c0_i32_1 = arith.constant 0 : i32
    return %c0_i32, %c0_i32_0 : i32, i32
  }
  func.func @transform_7(%arg0: i32) -> (i32, i32, i32) {
    %c0_i32 = arith.constant 0 : i32
    %c0_i32_0 = arith.constant 0 : i32
    %c0_i32_1 = arith.constant 0 : i32
    return %arg0, %c0_i32, %c0_i32_0 : i32, i32, i32
  }
}

</mosaic_0001>

<bundles_post_ra>
// kernel: tpu_custom_call.1
= control target key start
LH: loop header
LB: loop body
LE: loop exit
PB: predicated region body
PF: predicated region fallthrough
CT: control target
= control target key end

     0   :  { %12 = vsyncpa [#allocation4], 0  ;;  %s7015_s0 = inlined_call_operand.vmem [shape: f32[2], index: 0, kind: input, shape index: {}]   ;;  %s7016_s1 = inlined_call_operand.vmem [shape: f32[2,32,256], index: 1, kind: input, shape index: {}]   ;;  %s7017_s2 = inlined_call_operand.vmem [shape: f32[256,32], index: 2, kind: input, shape index: {}]   ;;  %s7018_s3 = inlined_call_operand.vmem [shape: f32[32,256], index: 3, kind: input, shape index: {}]   ;;  %s7019_s4 = inlined_call_operand.vmem [shape: f32[32,32], index: 4, kind: input, shape index: {}]   ;;  %s7020_s5 = inlined_call_operand.vmem [shape: f32[32,32], index: 5, kind: input, shape index: {}]   ;;  %s7021_s6 = inlined_call_operand.vmem [shape: f32[5,32], index: 6, kind: input, shape index: {}]   ;;  %s7022_s7 = inlined_call_operand.hbm [shape: f32[2,32,256], index: 7, kind: output, shape index: {}]  }
   0x1   :  { %13 = vsyncpa [#allocation3], 0 }
   0x2   :  { %15 = vsyncpa [#allocation3 + $0x1], 0  ;;  %s5554_s24 = smov 0   ;;  %s5556_s25 = smov 0  }
   0x3   :  { %s5558_s26 = smov 0   ;;  %s5560_s27 = smov 0  }
   0x4 LB: > { %s5575_s28 = sadd.s32 4294967295, %s5504_s27   ;;  %s4101_s29 = sadd.s32 4294967294, %s5504_s27   ;;  %s5504_s27 = sphi %s5560_s27, %s7350_s27   ;;  %s5500_s26 = sphi %s5558_s26, %s7349_s26   ;;  %s5496_s25 = sphi %s5556_s25, %s7348_s25   ;;  %s5492_s24 = sphi %s5554_s24, %s7347_s24  }
   0x5   : > { %s5579_s30 = sadd.s32 1, %s5504_s27   ;;  %s180_s8 = sadd.s32 1, %s5500_s26 }
   0x6   : > { %s177_s9 = ssub.s32 %s5504_s27, %s5579_s30  ;;  %p190_p0 = scmp.ne.s32.totalorder %s5500_s26, %s5496_s25 }
   0x7   : > { %p178_p1 = scmp.eq.s32.totalorder %s177_s9, 0  ;;  %p191_p2 = scmp.eq.s32.totalorder %s5575_s28, 1 }
   0x8   : > { %p196_p3 = scmp.ne.s32.totalorder %s5496_s25, %s5492_s24  ;;  %p197_p4 = scmp.eq.s32.totalorder %s4101_s29, 1 }
   0x9   : > { %s5590_s10 = scalar_select %p178_p1, %s5500_s26, %s180_s8  }
   0xa   : > { %p5592_p5 = por %p191_p2, %p190_p0  ;;  %p5596_p6 = por %p197_p4, %p196_p3 }
   0xb   : > { %p4102_p7 = scmp.ge.s32.totalorder %s5504_s27, 1  ;;  %p204_p8 = scmp.lt.s32.totalorder %s5504_s27, 3 }
   0xc   : > { %p5341_p9 = scmp.eq.s32.totalorder %s5575_s28, 0  ;;  %s217_s16 = sshll.u32 %s7015_s0, 4  ;;  %s218_s16 = int_to_ptr.vmem [resolvable:$true] %s217_s16 }
   0xd   : > { %p5603_p10 = pnand %p4102_p7, %p204_p8  ;;  %s5423_s17 = scalar_lea.vmem %s218_s16, 16 }
   0xe   : > { %p5424_p13 = scmp.ne.s32.totalorder %s218_s16, %s5423_s17  ;;  %p5431_p3 = scmp.lt.s32.totalorder %s218_s16, %s218_s16 }
   0xf   : > { %p5333_p11 = pneg %p5603_p10  ;;  %p5432_p4 = scmp.lt.s32.totalorder %s5423_s17, %s5423_s17 }
  0x11   : > { %p5334_p12 = pnand %p5341_p9, %p5333_p11  ;;  %p5433_p7 = por %p5432_p4, %p5431_p3 }
  0x13   : > { %p5425_p0 = pneg %p5334_p12 }
  0x15   : > { %p5426_p1 = pnand %p5425_p0, %p5424_p13 }
  0x17   : > { %p5427_p2 = pneg %p5426_p1 }
  0x19   : > { %p5434_p8 = pnand %p5433_p7, %p5427_p2 }
  0x1b   : > { %5437 = shalt.err (!%p5434_p8)
}
  0x1c   : > { %s5506_s18 = smov [#allocation2]   ;;  %253 = sbr.rel (%p5603_p10) target bundleno = 1412 (0x584), region = 48 }
  0x1d   : > { %5336 = dma.vmem_to_smem (!%p5334_p12), %s218_s16, 16, %s5506_s18, [#allocation4]  }
  0x23   : > { %5483 = dma.done.wait (%p5341_p9), [#allocation4], 16  }
  0x24   : > { %5485 = vsyncadd (%p5341_p9), [#allocation4], 4294967280 }
  0x25   : > { %259 = sfence }
  0x26   : > { %p286_p11 = scmp.lt.s32.totalorder %s5575_s28, 1  ;;  %v5662_v12 = vld [vmem:[%s7017_s2 + $0x80] sm:$0xff]  ;;  %v5667_v13 = vld [vmem:[%s7017_s2 + $0x88] sm:$0xff]  ;;  %v5698_v22 = vld [vmem:[%s7017_s2 + $0x90] sm:$0xff]  ;;  %vm475_vm0 = vcmask 261120   ;;  %s340_s8 = sld [smem:[#allocation2]] }
  0x27   : > { %v7044_v14 = vand.u32 4294901760, %v5662_v12  ;;  %v7043_v15 = vand.u32 4294901760, %v5667_v13  ;;  %v5674_v16 = vld [vmem:[%s7017_s2] sm:$0xff]  ;;  %v5679_v17 = vld [vmem:[%s7017_s2 + $0x8] sm:$0xff]  ;;  %v5703_v23 = vld [vmem:[%s7017_s2 + $0x98] sm:$0xff]  ;;  %v7038_v24 = vand.u32 4294901760, %v5698_v22 }
  0x28   : > { %s287_s19 = scalar_select %p286_p11, %s5575_s28, 1  ;;  %v7040_v18 = vand.u32 4294901760, %v5674_v16  ;;  %v7039_v19 = vand.u32 4294901760, %v5679_v17  ;;  %v7037_v25 = vand.u32 4294901760, %v5703_v23  ;;  %v5711_v26 = vld [vmem:[%s7017_s2 + $0x10] sm:$0xff]  ;;  %v5716_v27 = vld [vmem:[%s7017_s2 + $0x18] sm:$0xff] }
  0x29   : > { %v5687_v20 = vpack.c.bf16 %v7043_v15, %v7044_v14  ;;  %v7036_v28 = vand.u32 4294901760, %v5711_v26  ;;  %v7035_v29 = vand.u32 4294901760, %v5716_v27  ;;  %v5736_v32 = vld [vmem:[%s7017_s2 + $0xa0] sm:$0xff]  ;;  %v5741_v33 = vld [vmem:[%s7017_s2 + $0xa8] sm:$0xff]  ;;  %v5775_v42 = vld [vmem:[%s7017_s2 + $0xb0] sm:$0xff]  ;;  %s4110_s9 = sld [smem:[#allocation2 + $0x1]] }
  0x2a   : > { %s4121_s20 = sshll.u32 %s287_s19, 6  ;;  %v5693_v21 = vpack.c.bf16 %v7039_v19, %v7040_v18  ;;  %v5725_v30 = vpack.c.bf16 %v7037_v25, %v7038_v24  ;;  %v7034_v34 = vand.u32 4294901760, %v5736_v32  ;;  %v7033_v35 = vand.u32 4294901760, %v5741_v33  ;;  %v5750_v36 = vld [vmem:[%s7017_s2 + $0x20] sm:$0xff]  ;;  %v5755_v37 = vld [vmem:[%s7017_s2 + $0x28] sm:$0xff]  ;;  %v5780_v43 = vld [vmem:[%s7017_s2 + $0xb8] sm:$0xff] }
  0x2b   : > { %s5625_s23 = scalar_lea.vmem %s7016_s1, %s4121_s20  ;;  %4820 = vmatprep.subr.bf16.mxu1 %v5687_v20  ;;  %v5731_v31 = vpack.c.bf16 %v7035_v29, %v7036_v28  ;;  %v7032_v39 = vand.u32 4294901760, %v5750_v36  ;;  %v7031_v40 = vand.u32 4294901760, %v5755_v37  ;;  %v7030_v44 = vand.u32 4294901760, %v5775_v42  ;;  %v5795_v47 = vld [vmem:[%s7017_s2 + $0x30] sm:$0xff]  ;;  %v5800_v48 = vld [vmem:[%s7017_s2 + $0x38] sm:$0xff]  ;;  %v5813_v52 = vld [vmem:[%s7017_s2 + $0xc0] sm:$0xff] }
  0x2c   : > { %v5628_v0 = vld [vmem:[%s5625_s23] sm:$0xff]  ;;  %v5631_v1 = vld [vmem:[%s5625_s23 + $0x8] sm:$0xff]  ;;  %v5642_v5 = vld [vmem:[%s5625_s23 + $0x10] sm:$0xff]  ;;  %4822 = vmatpush3.bf16.msra.mxu1 %v5693_v21  ;;  %v5761_v38 = vpack.c.bf16 %v7033_v35, %v7034_v34  ;;  %v7029_v45 = vand.u32 4294901760, %v5780_v43  ;;  %v7028_v49 = vand.u32 4294901760, %v5795_v47  ;;  %v7027_v50 = vand.u32 4294901760, %v5800_v48 }
  0x2d   : > { %v5634_v2 = vld [vmem:[%s5625_s23 + $0x20] sm:$0xff]  ;;  %v350_v3 = vadd.f32 %v5631_v1, %v5628_v0  ;;  %v5639_v4 = vld [vmem:[%s5625_s23 + $0x28] sm:$0xff]  ;;  %v5645_v6 = vld [vmem:[%s5625_s23 + $0x18] sm:$0xff]  ;;  %7171 = vst [vmem:[#allocation8_spill] sm:$0xff] %v5731_v31  ;;  %4824 = vmatprep.subr.bf16.mxu1 %v5725_v30  ;;  %v5770_v41 = vpack.c.bf16 %v7031_v40, %v7032_v39  ;;  %v7024_v54 = vand.u32 4294901760, %v5813_v52  ;;  %vm5509_vm9 = vmmov 0  }
  0x2e   : > { %v356_v7 = vadd.f32 %v5639_v4, %v5634_v2  ;;  %v5650_v8 = vld [vmem:[%s5625_s23 + $0x30] sm:$0xff]  ;;  %v5653_v9 = vld [vmem:[%s5625_s23 + $0x38] sm:$0xff]  ;;  %v353_v10 = vadd.f32 %v5645_v6, %v5642_v5  ;;  %7172 = vst [vmem:[#allocation9_spill] sm:$0xff] %v5761_v38  ;;  %v5789_v46 = vpack.c.bf16 %v7029_v45, %v7030_v44  ;;  %v5808_v51 = vpack.c.bf16 %v7027_v50, %v7028_v49  ;;  %v5818_v53 = vld [vmem:[%s7017_s2 + $0xc8] sm:$0xff]  ;;  %s283_s19 = sand.u32 1, %s5496_s25   ;;  %s4122_s21 = sshll.u32 %s5575_s28, 10 }
  0x2f   : > { %351 = vadd.xlane.f32.xlu0 %v350_v3  ;;  %v359_v11 = vadd.f32 %v5653_v9, %v5650_v8  ;;  %7173 = vst [vmem:[#allocation10_spill] sm:$0xff] %v5770_v41  ;;  %v7023_v55 = vand.u32 4294901760, %v5818_v53  ;;  %v5825_v56 = vld [vmem:[%s7017_s2 + $0x40] sm:$0xff]  ;;  %v5830_v57 = vld [vmem:[%s7017_s2 + $0x48] sm:$0xff]  ;;  %v5844_v61 = vld [vmem:[%s7017_s2 + $0xd0] sm:$0xff]  ;;  %s4107_s20 = sshll.u32 %s283_s19, 6 }
  0x30   : > { %357 = vadd.xlane.f32.xlu1 %v356_v7  ;;  %4826 = vmatpush3.bf16.msra.mxu1 %v5731_v31  ;;  %7174 = vst [vmem:[#allocation11_spill] sm:$0xff] %v5789_v46  ;;  %7175 = vst [vmem:[#allocation12_spill] sm:$0xff] %v5808_v51  ;;  %v7026_v58 = vand.u32 4294901760, %v5825_v56  ;;  %v7025_v59 = vand.u32 4294901760, %v5830_v57  ;;  %v5849_v62 = vld [vmem:[%s7017_s2 + $0xd8] sm:$0xff]  ;;  %v5854_v63 = vld [vmem:[%s7017_s2 + $0x50] sm:$0xff] }
  0x31   : > { %4828 = vmatprep.subr.bf16.mxu1 %v5761_v38  ;;  %v5839_v60 = vpack.c.bf16 %v7023_v55, %v7024_v54  ;;  %v7042_v7 = vand.u32 4294901760, %v5844_v61  ;;  %v1197_v55 = vand.u32 4294901760, %v5854_v63  ;;  %v5873_v54 = vld [vmem:[%s7017_s2 + $0xe0] sm:$0xff]  ;;  %v304_v44 = vld [vmem:[%s7017_s2 + $0x68] sm:$0xff]  ;;  %v321_v40 = vld [vmem:[%s7017_s2 + $0xf0] sm:$0xff]  ;;  %v7188_v38 = vand.u32 4294901760, %v5679_v17 }
  0x32   : > { %v5860_v3 = vpack.c.bf16 %v7025_v59, %v7026_v58  ;;  %v5878_v59 = vld [vmem:[%s7017_s2 + $0xe8] sm:$0xff]  ;;  %v1251_v50 = vand.u32 4294901760, %v5873_v54  ;;  %v303_v45 = vld [vmem:[%s7017_s2 + $0x60] sm:$0xff]  ;;  %v1206_v34 = vand.u32 4294901760, %v304_v44  ;;  %v322_v29 = vld [vmem:[%s7017_s2 + $0xf8] sm:$0xff]  ;;  %v1257_v24 = vand.u32 4294901760, %v321_v40 }
  0x33   : > { %354 = vadd.xlane.f32.xlu0 %v353_v10  ;;  %7176 = vst [vmem:[#allocation13_spill] sm:$0xff] %v5839_v60  ;;  %v7041_v10 = vand.u32 4294901760, %v5849_v62  ;;  %v1254_v49 = vand.u32 4294901760, %v5878_v59  ;;  %v1203_v35 = vand.u32 4294901760, %v303_v45  ;;  %v1260_v19 = vand.u32 4294901760, %v322_v29  ;;  %v305_v18 = vld [vmem:[%s7017_s2 + $0x70] sm:$0xff] }
  0x34   : > { %360 = vadd.xlane.f32.xlu1 %v359_v11  ;;  %4830 = vmatpush3.bf16.msra.mxu1 %v5770_v41  ;;  %7177 = vst [vmem:[#allocation14_spill] sm:$0xff] %v5860_v3  ;;  %v5867_v11 = vld [vmem:[%s7017_s2 + $0x58] sm:$0xff]  ;;  %v1209_v15 = vand.u32 4294901760, %v305_v18  ;;  %s6946_s22 = scalar_lea.vmem [#allocation5], %s4107_s20  ;;  %s6974_s13 = scalar_lea.sflag [#allocation3], %s283_s19 }
  0x35   : > { %4832 = vmatprep.subr.bf16.mxu1 %v5789_v46  ;;  %v1200_v58 = vand.u32 4294901760, %v5867_v11  ;;  %v5898_v39 = vpack.c.bf16 %v7041_v10, %v7042_v7  ;;  %v5905_v25 = vpack.c.bf16 %v1254_v49, %v1251_v50  ;;  %v306_v10 = vld [vmem:[%s7017_s2 + $0x78] sm:$0xff]  ;;  %v5915_v7 = vpack.c.bf16 %v1206_v34, %v1203_v35  ;;  %s4027_s29 = sshll.u32 %s6946_s22, 4  ;;  %s5511_s15 = smov [#allocation5]   ;;  %s6958_s29 = int_to_ptr.vmem [resolvable:$true] %s4027_s29 }
  0x36   : > { %v1212_v14 = vand.u32 4294901760, %v306_v10  ;;  %v7185_v46 = vand.u32 4294901760, %v5667_v13  ;;  %s5438_s14 = scalar_lea.vmem %s6958_s29, 1024 }
  0x37   : > { %7178 = vst [vmem:[#allocation15_spill] sm:$0xff] %v5898_v39  ;;  %v5903_v28 = vpack.c.bf16 %v1200_v58, %v1197_v55  ;;  %7180 = vst [vmem:[#allocation17_spill] sm:$0xff] %v5905_v25  ;;  %p5439_p9 = scmp.ne.s32.totalorder %s6958_s29, %s5438_s14 }
  0x38   : > { %4834 = vmatpush3.bf16.msra.mxu1 %v5808_v51  ;;  %7181 = vst [vmem:[#allocation18_spill] sm:$0xff] %v5915_v7  ;;  %v5928_v41 = vsub.f32 %v5667_v13, %v7185_v46 }
  0x39   : > { %4836 = vmatprep.subr.bf16.mxu1 %v5839_v60  ;;  %7179 = vst [vmem:[#allocation16_spill] sm:$0xff] %v5903_v28  ;;  %v7183_v60 = vand.u32 4294901760, %v5662_v12  ;;  %p5440_p10 = pnand %p5439_p9, %p5592_p5 }
  0x3a   : > { %7186 = vst [vmem:[#allocation21_spill] sm:$0xff] %v5928_v41 }
  0x3b   : > { %v5923_v51 = vsub.f32 %v5662_v12, %v7183_v60  ;;  %v7072_v12 = vand.u32 4294901760, %v5928_v41  ;;  %v5943_v60 = vpack.c.bf16 %v1212_v14, %v1209_v15  ;;  %p5441_p12 = pneg %p5440_p10 }
  0x3c   : > { %4838 = vmatpush3.bf16.msra.mxu1 %v5860_v3  ;;  %v5918_v3 = vpack.c.bf16 %v1260_v19, %v1257_v24 }
  0x3d   : > { %4840 = vmatprep.subr.bf16.mxu1 %v5898_v39  ;;  %7184 = vst [vmem:[#allocation20_spill] sm:$0xff] %v5923_v51  ;;  %v7069_v31 = vand.u32 4294901760, %v5923_v51 }
  0x3e   : > { %7182 = vst [vmem:[#allocation19_spill] sm:$0xff] %v5918_v3 }
  0x3f   : > { %v1394_v13 = vsub.f32 %v5923_v51, %v7069_v31  ;;  %v7192_v31 = vand.u32 4294901760, %v5716_v27 }
  0x40   : > { %4842 = vmatpush3.bf16.msra.mxu1 %v5903_v28  ;;  %v7187_v28 = vand.u32 4294901760, %v5674_v16 }
  0x41   : > { %4844 = vmatprep.subr.bf16.mxu1 %v5905_v25  ;;  %v5938_v25 = vsub.f32 %v5679_v17, %v7188_v38  ;;  %v7189_v17 = vand.u32 4294901760, %v5698_v22  ;;  %v7190_v38 = vand.u32 4294901760, %v5703_v23  ;;  %v5970_v51 = vsub.f32 %v5716_v27, %v7192_v31 }
  0x42   : > { %v5933_v39 = vsub.f32 %v5674_v16, %v7187_v28  ;;  %v1401_v16 = vsub.f32 %v5928_v41, %v7072_v12  ;;  %v1395_v12 = vand.u32 4294901760, %v1394_v13  ;;  %v7196_v27 = vand.u32 4294901760, %v5750_v36 }
  0x43   : > { %v5955_v28 = vsub.f32 %v5698_v22, %v7189_v17  ;;  %v5960_v46 = vsub.f32 %v5703_v23, %v7190_v38  ;;  %v7193_v17 = vand.u32 4294901760, %v5736_v32  ;;  %v7194_v38 = vand.u32 4294901760, %v5741_v33 }
  0x44   : > { %4846 = vmatpush3.bf16.msra.mxu1 %v5915_v7  ;;  %v1402_v41 = vand.u32 4294901760, %v1401_v16  ;;  %v5989_v31 = vsub.f32 %v5750_v36, %v7196_v27  ;;  %v7201_v16 = vand.u32 4294901760, %v5795_v47  ;;  %v7207_v27 = vand.u32 4294901760, %v5818_v53 }
  0x45   : > { %4848 = vmatprep.subr.bf16.mxu1 %v5918_v3  ;;  %v7191_v3 = vand.u32 4294901760, %v5711_v26  ;;  %v5978_v23 = vsub.f32 %v5736_v32, %v7193_v17  ;;  %v7199_v32 = vand.u32 4294901760, %v5775_v42  ;;  %v7203_v17 = vand.u32 4294901760, %v5800_v48 }
  0x46   : > { %v5973_v22 = vpack.c.bf16 %v1402_v41, %v1395_v12  ;;  %7197 = vst [vmem:[#allocation23_spill] sm:$0xff] %v5989_v31  ;;  %v7198_v41 = vand.u32 4294901760, %v5755_v37  ;;  %v6009_v36 = vsub.f32 %v5795_v47, %v7201_v16  ;;  %v7215_v16 = vand.u32 4294901760, %v5849_v62 }
  0x47   : > { %v5965_v7 = vsub.f32 %v5711_v26, %v7191_v3  ;;  %v5983_v26 = vsub.f32 %v5741_v33, %v7194_v38  ;;  %v5999_v12 = vsub.f32 %v5775_v42, %v7199_v32  ;;  %v7200_v33 = vand.u32 4294901760, %v5780_v43 }
  0x48   : > { %4850 = vmatpush3.bf16.msra.mxu1 %v5943_v60  ;;  %v5994_v3 = vsub.f32 %v5755_v37, %v7198_v41  ;;  %7202 = vst [vmem:[#allocation24_spill] sm:$0xff] %v6009_v36  ;;  %v6014_v37 = vsub.f32 %v5800_v48, %v7203_v17  ;;  %v7205_v38 = vand.u32 4294901760, %v5813_v52  ;;  %v7209_v41 = vand.u32 4294901760, %v5825_v56 }
  0x49   : > { %7195 = vst [vmem:[#allocation22_spill] sm:$0xff] %v5983_v26  ;;  %4852 = vmatprep.subr.bf16.mxu1 %v5973_v22  ;;  %v6004_v13 = vsub.f32 %v5780_v43, %v7200_v33  ;;  %v6024_v43 = vsub.f32 %v5818_v53, %v7207_v27  ;;  %v7211_v32 = vand.u32 4294901760, %v5830_v57  ;;  %v7213_v33 = vand.u32 4294901760, %v5844_v61 }
  0x4a   : > { %7204 = vst [vmem:[#allocation25_spill] sm:$0xff] %v6014_v37  ;;  %v6019_v42 = vsub.f32 %v5813_v52, %v7205_v38  ;;  %v6029_v47 = vsub.f32 %v5825_v56, %v7209_v41  ;;  %v6044_v53 = vsub.f32 %v5849_v62, %v7215_v16  ;;  %v6047_v17 = vsub.f32 %v5854_v63, %v1197_v55 }
  0x4b   : > { %7208 = vst [vmem:[#allocation27_spill] sm:$0xff] %v6024_v43  ;;  %v6034_v48 = vsub.f32 %v5830_v57, %v7211_v32  ;;  %v6039_v52 = vsub.f32 %v5844_v61, %v7213_v33  ;;  %v6050_v56 = vsub.f32 %v5867_v11, %v1200_v58  ;;  %v6053_v38 = vsub.f32 %v5873_v54, %v1251_v50 }
  0x4c   : > { %7206 = vst [vmem:[#allocation26_spill] sm:$0xff] %v6019_v42  ;;  %7210 = vst [vmem:[#allocation28_spill] sm:$0xff] %v6029_v47  ;;  %v6056_v57 = vsub.f32 %v5878_v59, %v1254_v49  ;;  %v6058_v27 = vsub.f32 %v303_v45, %v1203_v35  ;;  %v6060_v61 = vsub.f32 %v304_v44, %v1206_v34 }
  0x4d   : > { %7212 = vst [vmem:[#allocation29_spill] sm:$0xff] %v6034_v48  ;;  %7214 = vst [vmem:[#allocation30_spill] sm:$0xff] %v6039_v52  ;;  %v6062_v41 = vsub.f32 %v321_v40, %v1257_v24  ;;  %v6064_v62 = vsub.f32 %v322_v29, %v1260_v19  ;;  %v6066_v32 = vsub.f32 %v305_v18, %v1209_v15 }
  0x4e   : > { %7216 = vst [vmem:[#allocation31_spill] sm:$0xff] %v6044_v53  ;;  %7217 = vst [vmem:[#allocation32_spill] sm:$0xff] %v6047_v17  ;;  %v6068_v55 = vsub.f32 %v306_v10, %v1212_v14 }
  0x4f   : > { %7218 = vst [vmem:[#allocation33_spill] sm:$0xff] %v6050_v56  ;;  %7219 = vst [vmem:[#allocation34_spill] sm:$0xff] %v6053_v38 }
  0x50   : > { %7220 = vst [vmem:[#allocation35_spill] sm:$0xff] %v6056_v57  ;;  %7221 = vst [vmem:[#allocation36_spill] sm:$0xff] %v6058_v27 }
  0x51   : > { %7222 = vst [vmem:[#allocation37_spill] sm:$0xff] %v6060_v61  ;;  %7223 = vst [vmem:[#allocation38_spill] sm:$0xff] %v6062_v41 }
  0x52   : > { %7224 = vst [vmem:[#allocation39_spill] sm:$0xff] %v6064_v62  ;;  %7225 = vst [vmem:[#allocation40_spill] sm:$0xff] %v6066_v32 }
  0x53   : > { %7226 = vst [vmem:[#allocation41_spill] sm:$0xff] %v6068_v55 }
  0xbc   : > { %v6070_v58 = vpop.xlane.xlu0 %351 }
  0xbd   : > { %7227 = vst [vmem:[#allocation42_spill] sm:$0xff] %v6070_v58  ;;  %v6072_v63 = vpop.xlane.xlu1 %357 }
  0xbe   : > { %7228 = vst [vmem:[#allocation43_spill] sm:$0xff] %v6072_v63 }
  0xc0   : > { %v6074_v50 = vpop.xlane.xlu0 %354 }
  0xc1   : > { %7229 = vst [vmem:[#allocation44_spill] sm:$0xff] %v6074_v50  ;;  %v362_v35 = vadd.f32 %v6074_v50, %v6070_v58  ;;  %v6078_v45 = vpop.xlane.xlu1 %360 }
  0xc2   : > { %7230 = vst [vmem:[#allocation45_spill] sm:$0xff] %v6078_v45 }
  0xc3   : > { %v363_v24 = vadd.f32 %v362_v35, %v6072_v63 }
  0xc5   : > { %v364_v19 = vadd.f32 %v363_v24, %v6078_v45 }
  0xc7   : > { %v365_v29 = vrot.slane %v364_v19, 4 }
  0xc9   : > { %v366_v15 = vadd.f32 %v365_v29, %v364_v19 }
  0xcb   : > { %v367_v18 = vrot.slane %v366_v15, 2 }
  0xcd   : > { %v368_v14 = vadd.f32 %v367_v18, %v366_v15 }
  0xcf   : > { %v369_v34 = vrot.slane %v368_v14, 1 }
  0xd1   : > { %v370_v40 = vadd.f32 %v369_v34, %v368_v14 }
  0xd3   : > { %v6082_v44 = vmul.f32 0.00012207031, %v370_v40 }
  0xd5   : > { %7231 = vst [vmem:[#allocation46_spill] sm:$0xff] %v6082_v44  ;;  %v374_v49 = vsub.f32 %v5642_v5, %v6082_v44  ;;  %v375_v54 = vsub.f32 %v5645_v6, %v6082_v44  ;;  %v372_v59 = vsub.f32 %v5628_v0, %v6082_v44  ;;  %v373_v10 = vsub.f32 %v5631_v1, %v6082_v44 }
  0xd6   : > { %v378_v11 = vsub.f32 %v5650_v8, %v6082_v44  ;;  %v379_v33 = vsub.f32 %v5653_v9, %v6082_v44  ;;  %v376_v16 = vsub.f32 %v5634_v2, %v6082_v44  ;;  %v377_v8 = vsub.f32 %v5639_v4, %v6082_v44 }
  0xd7   : > { %v382_v35 = vmul.f32 %v374_v49, %v374_v49  ;;  %v383_v5 = vmul.f32 %v375_v54, %v375_v54  ;;  %v380_v24 = vmul.f32 %v372_v59, %v372_v59  ;;  %v381_v19 = vmul.f32 %v373_v10, %v373_v10 }
  0xd8   : > { %v1130_v6 = vadd.f32 %v374_v49, %v372_v59  ;;  %v1139_v29 = vadd.f32 %v375_v54, %v373_v10  ;;  %v386_v18 = vmul.f32 %v378_v11, %v378_v11  ;;  %v387_v14 = vmul.f32 %v379_v33, %v379_v33 }
  0xd9   : > { %v396_v15 = vadd.f32 %v383_v5, %v382_v35  ;;  %v1148_v0 = vadd.f32 %v382_v35, %v380_v24  ;;  %v393_v1 = vadd.f32 %v381_v19, %v380_v24  ;;  %v1157_v34 = vadd.f32 %v383_v5, %v381_v19 }
  0xda   : > { %v384_v40 = vmul.f32 %v376_v16, %v376_v16  ;;  %v1131_v9 = vadd.f32 %v1130_v6, %v376_v16  ;;  %v385_v2 = vmul.f32 %v377_v8, %v377_v8  ;;  %v1140_v63 = vadd.f32 %v1139_v29, %v377_v8 }
  0xdb   : > { %397 = vadd.xlane.f32.xlu1 %v396_v15  ;;  %394 = vadd.xlane.f32.xlu0 %v393_v1  ;;  %v402_v58 = vadd.f32 %v387_v14, %v386_v18  ;;  %v7086_v29 = vand.u32 4294901760, %v5933_v39  ;;  %v7084_v15 = vand.u32 4294901760, %v5938_v25 }
  0xdc   : > { %v1149_v45 = vadd.f32 %v1148_v0, %v384_v40  ;;  %v1132_v50 = vadd.f32 %v1131_v9, %v378_v11  ;;  %v399_v49 = vadd.f32 %v385_v2, %v384_v40  ;;  %v1141_v54 = vadd.f32 %v1140_v63, %v379_v33 }
  0xdd   : > { %v1158_v10 = vadd.f32 %v1157_v34, %v385_v2  ;;  %v7079_v34 = vand.u32 4294901760, %v5965_v7  ;;  %v7080_v2 = vand.u32 4294901760, %v5970_v51 }
  0xde   : > { %v6100_v59 = vadd.f32 %v1149_v45, %v386_v18  ;;  %v1133_v35 = vrot.slane %v1132_v50, 4  ;;  %v1142_v5 = vrot.slane %v1141_v54, 4  ;;  %v7083_v45 = vand.u32 4294901760, %v5955_v28 }
  0xdf   : > { %403 = vadd.xlane.f32.xlu1 %v402_v58  ;;  %v6102_v24 = vadd.f32 %v1158_v10, %v387_v14  ;;  %400 = vadd.xlane.f32.xlu0 %v399_v49  ;;  %v7082_v58 = vand.u32 4294901760, %v5960_v46  ;;  %v1282_v18 = vsub.f32 %v5933_v39, %v7086_v29  ;;  %v7095_v29 = vand.u32 4294901760, %v6009_v36 }
  0xe0   : > { %v1134_v4 = vadd.f32 %v1133_v35, %v1132_v50  ;;  %v1143_v19 = vadd.f32 %v1142_v5, %v1141_v54  ;;  %v1289_v50 = vsub.f32 %v5938_v25, %v7084_v15  ;;  %v1408_v40 = vsub.f32 %v5955_v28, %v7083_v45 }
  0xe1   : > { %v1415_v9 = vsub.f32 %v5960_v46, %v7082_v58  ;;  %v1283_v54 = vand.u32 4294901760, %v1282_v18  ;;  %v7081_v35 = vand.u32 4294901760, %v5978_v23  ;;  %v1303_v18 = vsub.f32 %v5970_v51, %v7080_v2 }
  0xe2   : > { %v1135_v16 = vrot.slane %v1134_v4, 2  ;;  %v1144_v6 = vrot.slane %v1143_v19, 2  ;;  %v1290_v10 = vand.u32 4294901760, %v1289_v50  ;;  %v7096_v2 = vand.u32 4294901760, %v6014_v37 }
  0xe4   : > { %v1136_v11 = vadd.f32 %v1135_v16, %v1134_v4  ;;  %v1145_v0 = vadd.f32 %v1144_v6, %v1143_v19  ;;  %v7085_v4 = vand.u32 4294901760, %v5983_v26  ;;  %v1296_v16 = vsub.f32 %v5965_v7, %v7079_v34 }
  0xe5   : > { %v7091_v6 = vand.u32 4294901760, %v5989_v31 }
  0xe6   : > { %v1137_v63 = vrot.slane %v1136_v11, 1  ;;  %v1146_v33 = vrot.slane %v1145_v0, 1 }
  0xe8   : > { %v1138_v14 = vadd.f32 %v1137_v63, %v1136_v11  ;;  %v1147_v1 = vadd.f32 %v1146_v33, %v1145_v0  ;;  %v7094_v11 = vand.u32 4294901760, %v5994_v3  ;;  %v1409_v63 = vand.u32 4294901760, %v1408_v40 }
  0xe9   : > { %v1416_v33 = vand.u32 4294901760, %v1415_v9  ;;  %v1429_v40 = vsub.f32 %v5983_v26, %v7085_v4  ;;  %v1304_v4 = vand.u32 4294901760, %v1303_v18 }
  0xea   : > { %v6115_v8 = vand.u32 4294901760, %v1138_v14  ;;  %v6124_v49 = vand.u32 4294901760, %v1147_v1  ;;  %v1317_v58 = vsub.f32 %v5994_v3, %v7094_v11  ;;  %v7099_v11 = vand.u32 4294901760, %v6034_v48 }
  0xeb   : > { %v6166_v15 = vpack.c.bf16 %v1416_v33, %v1409_v63  ;;  %v1430_v26 = vand.u32 4294901760, %v1429_v40  ;;  %v7105_v40 = vand.u32 4294901760, %v6044_v53 }
  0xec   : > { %7232 = vst [vmem:[#allocation47_spill] sm:$0xff] %v6115_v8  ;;  %7233 = vst [vmem:[#allocation48_spill] sm:$0xff] %v6124_v49  ;;  %v6128_v5 = vsub.f32 %v1138_v14, %v6115_v8  ;;  %v6132_v19 = vsub.f32 %v1147_v1, %v6124_v49  ;;  %v6144_v14 = vpack.c.bf16 %v1290_v10, %v1283_v54  ;;  %v1297_v10 = vand.u32 4294901760, %v1296_v16 }
  0xed   : > { %v1422_v1 = vsub.f32 %v5978_v23, %v7081_v35  ;;  %v1310_v35 = vsub.f32 %v5989_v31, %v7091_v6  ;;  %v7097_v16 = vand.u32 4294901760, %v6024_v43  ;;  %v7235_v6 = vand.u32 4294901760, %v5999_v12 }
  0xee   : > { %7234 = vst [vmem:[#allocation49_spill] sm:$0xff] %v6128_v5  ;;  %v7087_v0 = vand.u32 4294901760, %v6128_v5  ;;  %v7088_v50 = vand.u32 4294901760, %v6132_v19  ;;  %v1318_v18 = vand.u32 4294901760, %v1317_v58  ;;  %v1331_v58 = vsub.f32 %v6014_v37, %v7096_v2 }
  0xef   : > { %v1423_v9 = vand.u32 4294901760, %v1422_v1  ;;  %v1436_v31 = vsub.f32 %v5999_v12, %v7235_v6  ;;  %v1311_v33 = vand.u32 4294901760, %v1310_v35  ;;  %v1324_v1 = vsub.f32 %v6009_v36, %v7095_v29 }
  0xf0   : > { %v1271_v34 = vsub.f32 %v6128_v5, %v7087_v0  ;;  %v1265_v54 = vsub.f32 %v6132_v19, %v7088_v50  ;;  %v6180_v50 = vpack.c.bf16 %v1304_v4, %v1297_v10  ;;  %v7100_v6 = vand.u32 4294901760, %v6039_v52 }
  0xf1   : > { %v1457_v4 = vsub.f32 %v6024_v43, %v7097_v16  ;;  %v1437_v10 = vand.u32 4294901760, %v1436_v31  ;;  %v6201_v29 = vpack.c.bf16 %v1318_v18, %v1311_v33  ;;  %v1332_v33 = vand.u32 4294901760, %v1331_v58 }
  0xf2   : > { %v1272_v45 = vand.u32 4294901760, %v1271_v34  ;;  %v1266_v0 = vand.u32 4294901760, %v1265_v54  ;;  %v7236_v34 = vand.u32 4294901760, %v6004_v13  ;;  %v7098_v54 = vand.u32 4294901760, %v6029_v47 }
  0xf3   : > { %v1464_v16 = vsub.f32 %v6039_v52, %v7100_v6  ;;  %v7111_v6 = vand.u32 4294901760, %v6053_v38  ;;  %v7110_v52 = vand.u32 4294901760, %v6056_v57 }
  0xf4   : > { %v1443_v63 = vsub.f32 %v6004_v13, %v7236_v34  ;;  %1267 = vmatprep.mubr.f32.mxu1 %v1266_v0  ;;  %v6199_v0 = vpack.c.bf16 %v1430_v26, %v1423_v9  ;;  %v1338_v2 = vsub.f32 %v6029_v47, %v7098_v54  ;;  %v1471_v26 = vsub.f32 %v6044_v53, %v7105_v40 }
  0xf5   : > { %1273 = vmatmul.mubr.f32.vlgmr.msra.gmra.mrb[0].mxu1 %v1272_v45  ;;  %v7237_v45 = vand.u32 4294901760, %v6019_v42  ;;  %v1458_v54 = vand.u32 4294901760, %v1457_v4  ;;  %v1465_v53 = vand.u32 4294901760, %v1464_v16  ;;  %v7238_v9 = vand.u32 4294901760, %v6047_v17 }
  0xf6   : > { %4854 = vmatpush3.bf16.msra.mxu1 %v6144_v14  ;;  %1503 = vmatprep.mubr.f32.mxu1 %v6124_v49  ;;  %v1444_v34 = vand.u32 4294901760, %v1443_v63  ;;  %v1325_v63 = vand.u32 4294901760, %v1324_v1  ;;  %v1472_v31 = vand.u32 4294901760, %v1471_v26  ;;  %v7239_v1 = vand.u32 4294901760, %v6050_v56 }
  0xf7   : > { %v1450_v35 = vsub.f32 %v6019_v42, %v7237_v45  ;;  %4856 = vmatprep.subr.bf16.mxu1 %v6166_v15  ;;  %v1345_v45 = vsub.f32 %v6034_v48, %v7099_v11  ;;  %v1339_v48 = vand.u32 4294901760, %v1338_v2  ;;  %v1352_v47 = vsub.f32 %v6047_v17, %v7238_v9 }
  0xf8   : > { %v6219_v11 = vpack.c.bf16 %v1444_v34, %v1437_v10  ;;  %v1359_v58 = vsub.f32 %v6050_v56, %v7239_v1  ;;  %v7113_v10 = vand.u32 4294901760, %v6058_v27  ;;  %v7112_v2 = vand.u32 4294901760, %v6060_v61 }
  0xf9   : > { %v1451_v18 = vand.u32 4294901760, %v1450_v35  ;;  %v1346_v40 = vand.u32 4294901760, %v1345_v45  ;;  %v6230_v35 = vpack.c.bf16 %v1332_v33, %v1325_v63  ;;  %v1478_v16 = vsub.f32 %v6053_v38, %v7111_v6 }
  0xfa   : > { %4858 = vmatpush3.bf16.msra.mxu1 %v6180_v50  ;;  %v1485_v34 = vsub.f32 %v6056_v57, %v7110_v52  ;;  %v7114_v45 = vand.u32 4294901760, %v6062_v41  ;;  %v7115_v26 = vand.u32 4294901760, %v6064_v62  ;;  %v6247_v9 = vpack.c.bf16 %v1472_v31, %v1465_v53  ;;  %v7258_v57 = vld [vmem:[#allocation43_spill] sm:$0xff] }
  0xfb   : > { %4860 = vmatprep.subr.bf16.mxu1 %v6199_v0  ;;  %v6232_v4 = vpack.c.bf16 %v1458_v54, %v1451_v18  ;;  %v6245_v54 = vpack.c.bf16 %v1346_v40, %v1339_v48  ;;  %v1353_v63 = vand.u32 4294901760, %v1352_v47  ;;  %v1360_v33 = vand.u32 4294901760, %v1359_v58 }
  0xfc   : > { %v1366_v18 = vsub.f32 %v6058_v27, %v7113_v10  ;;  %v1373_v1 = vsub.f32 %v6060_v61, %v7112_v2  ;;  %v7117_v52 = vand.u32 4294901760, %v6066_v32  ;;  %v7116_v6 = vand.u32 4294901760, %v6068_v55 }
  0xfd   : > { %v1479_v48 = vand.u32 4294901760, %v1478_v16  ;;  %v1486_v53 = vand.u32 4294901760, %v1485_v34  ;;  %v1492_v47 = vsub.f32 %v6062_v41, %v7114_v45  ;;  %v1499_v40 = vsub.f32 %v6064_v62, %v7115_v26 }
  0xfe   : > { %4862 = vmatpush3.bf16.msra.mxu1 %v6201_v29  ;;  %v6265_v31 = vpack.c.bf16 %v1360_v33, %v1353_v63  ;;  %v1367_v58 = vand.u32 4294901760, %v1366_v18  ;;  %v1374_v2 = vand.u32 4294901760, %v1373_v1  ;;  %v1380_v10 = vsub.f32 %v6066_v32, %v7117_v52  ;;  %v7248_v52 = vld [vmem:[#allocation15_spill] sm:$0xff] }
  0xff   : > { %4864 = vmatprep.subr.bf16.mxu1 %v6219_v11  ;;  %v1387_v16 = vsub.f32 %v6068_v55, %v7116_v6  ;;  %v6275_v34 = vpack.c.bf16 %v1486_v53, %v1479_v48  ;;  %v1493_v45 = vand.u32 4294901760, %v1492_v47  ;;  %v1500_v26 = vand.u32 4294901760, %v1499_v40  ;;  %v335_v6 = vld [vmem:[%s7020_s5] sm:$0xff]  ;;  %v7252_v55 = vld [vmem:[#allocation19_spill] sm:$0xff] }
 0x100   : > { %v6278_v63 = vpack.c.bf16 %v1374_v2, %v1367_v58  ;;  %v1381_v33 = vand.u32 4294901760, %v1380_v10  ;;  %v477_v48 = vsel %vm475_vm0, %v335_v6, 0  ;;  %v7241_v40 = vld [vmem:[#allocation8_spill] sm:$0xff]  ;;  %v7242_v58 = vld [vmem:[#allocation9_spill] sm:$0xff]  ;;  %v7253_v32 = vand.u32 4294901760, %v6128_v5 }
 0x101   : > { %v1388_v18 = vand.u32 4294901760, %v1387_v16  ;;  %v6281_v1 = vpack.c.bf16 %v1500_v26, %v1493_v45  ;;  %v6287_v53 = vand.u32 4294901760, %v477_v48  ;;  %v7240_v26 = vand.u32 4294901760, %v6132_v19  ;;  %v7243_v16 = vld [vmem:[#allocation10_spill] sm:$0xff] }
 0x102   : > { %4866 = vmatpush3.bf16.msra.mxu1 %v6230_v35  ;;  %v1160_v62 = vrot.slane %v6102_v24, 4 }
 0x103   : > { %4868 = vmatprep.subr.bf16.mxu1 %v6232_v4  ;;  %v6290_v47 = vpack.c.bf16 %v1388_v18, %v1381_v33  ;;  %v6294_v10 = vsub.f32 %v477_v48, %v6287_v53  ;;  %v7244_v33 = vld [vmem:[#allocation11_spill] sm:$0xff]  ;;  %v7245_v18 = vld [vmem:[#allocation12_spill] sm:$0xff]  ;;  %v7246_v48 = vld [vmem:[#allocation13_spill] sm:$0xff] }
 0x104   : > { %v1161_v41 = vadd.f32 %v1160_v62, %v6102_v24 }
 0x105   : > { %v7118_v2 = vand.u32 4294901760, %v6294_v10 }
 0x106   : > { %4870 = vmatpush3.bf16.msra.mxu1 %v6245_v54 }
 0x107   : > { %4872 = vmatprep.subr.bf16.mxu1 %v6247_v9  ;;  %v560_v6 = vsub.f32 %v6294_v10, %v7118_v2  ;;  %v7250_v2 = vld [vmem:[#allocation17_spill] sm:$0xff] }
 0x109   : > { %v561_v45 = vand.u32 4294901760, %v560_v6  ;;  %v7247_v6 = vld [vmem:[#allocation14_spill] sm:$0xff] }
 0x10a   : > { %4874 = vmatpush3.bf16.msra.mxu1 %v6265_v31 }
 0x10b   : > { %4876 = vmatprep.subr.bf16.mxu1 %v6275_v34  ;;  %4629 = vmatprep.mubr.f32.mxu0 %v561_v45  ;;  %v7251_v45 = vld [vmem:[#allocation18_spill] sm:$0xff] }
 0x10e   : > { %4878 = vmatpush3.bf16.msra.mxu1 %v6278_v63 }
 0x10f   : > { %4880 = vmatprep.subr.bf16.mxu1 %v6281_v1 }
 0x112   : > { %4882 = vmatpush3.bf16.msra.mxu1 %v6290_v47 }
 0x113   : > { %4916 = vmatprep.subr.bf16.mxu1 %v5687_v20 }
 0x115   : > { %1505 = vmatmul.mubr.f32.vlgmr.msra.gmra.mrb[2].mxu1 %v6115_v8 }
 0x116   : > { %4918 = vmatpush3.bf16.msra.mxu1 %v5693_v21  ;;  %1747 = vmatprep.mubr.f32.mxu1 %v7240_v26  ;;  %v7249_v26 = vld [vmem:[#allocation16_spill] sm:$0xff] }
 0x117   : > { %4920 = vmatprep.subr.bf16.mxu1 %v5725_v30 }
 0x11a   : > { %4922 = vmatpush3.bf16.msra.mxu1 %v7241_v40 }
 0x11b   : > { %4924 = vmatprep.subr.bf16.mxu1 %v7242_v58 }
 0x11e   : > { %4926 = vmatpush3.bf16.msra.mxu1 %v7243_v16 }
 0x11f   : > { %4928 = vmatprep.subr.bf16.mxu1 %v7244_v33 }
 0x122   : > { %4930 = vmatpush3.bf16.msra.mxu1 %v7245_v18 }
 0x123   : > { %4932 = vmatprep.subr.bf16.mxu1 %v7246_v48 }
 0x126   : > { %4934 = vmatpush3.bf16.msra.mxu1 %v7247_v6 }
 0x127   : > { %4936 = vmatprep.subr.bf16.mxu1 %v7248_v52 }
 0x12a   : > { %4938 = vmatpush3.bf16.msra.mxu1 %v7249_v26 }
 0x12b   : > { %4940 = vmatprep.subr.bf16.mxu1 %v7250_v2 }
 0x12e   : > { %4942 = vmatpush3.bf16.msra.mxu1 %v7251_v45 }
 0x12f   : > { %4944 = vmatprep.subr.bf16.mxu1 %v7252_v55 }
 0x132   : > { %4946 = vmatpush3.bf16.msra.mxu1 %v5943_v60 }
 0x133   : > { %4980 = vmatprep.subr.bf16.mxu1 %v5687_v20 }
 0x135   : > { %1751 = vmatmul.mubr.f32.vlgmr.msra.gmra.mrb[4].mxu1 %v7253_v32  ;;  %v1162_v32 = vrot.slane %v1161_v41, 2 }
 0x136   : > { %4982 = vmatpush3.bf16.msra.mxu1 %v5693_v21  ;;  %2021 = vmatprep.mubr.f32.mxu1 %v6124_v49 }
 0x137   : > { %4984 = vmatprep.subr.bf16.mxu1 %v5725_v30  ;;  %v1163_v49 = vadd.f32 %v1162_v32, %v1161_v41  ;;  %v388_v41 = vmul.f32 256.0, %v6082_v44  ;;  %v7256_v32 = vld [vmem:[#allocation42_spill] sm:$0xff] }
 0x139   : > { %v1164_v5 = vrot.slane %v1163_v49, 1  ;;  %v389_v61 = vsub.f32 %v7256_v32, %v388_v41  ;;  %v391_v38 = vsub.f32 %v7258_v57, %v388_v41 }
 0x13a   : > { %4986 = vmatpush3.bf16.msra.mxu1 %v7241_v40 }
 0x13b   : > { %4988 = vmatprep.subr.bf16.mxu1 %v7242_v58  ;;  %v1165_v62 = vadd.f32 %v1164_v5, %v1163_v49  ;;  %v1151_v49 = vrot.slane %v6100_v59, 4  ;;  %v7255_v5 = vld [vmem:[#allocation44_spill] sm:$0xff]  ;;  %v6359_v27 = vmul.f32 0.00390625, %v389_v61 }
 0x13d   : > { %v6342_v24 = vand.u32 4294901760, %v1165_v62 }
 0x13e   : > { %4990 = vmatpush3.bf16.msra.mxu1 %v7243_v16 }
 0x13f   : > { %4992 = vmatprep.subr.bf16.mxu1 %v7244_v33  ;;  %7254 = vst [vmem:[#allocation8_spill] sm:$0xff] %v6342_v24 }
 0x142   : > { %4994 = vmatpush3.bf16.msra.mxu1 %v7245_v18 }
 0x143   : > { %4996 = vmatprep.subr.bf16.mxu1 %v7246_v48 }
 0x146   : > { %4998 = vmatpush3.bf16.msra.mxu1 %v7247_v6 }
 0x147   : > { %5000 = vmatprep.subr.bf16.mxu1 %v7248_v52 }
 0x14a   : > { %5002 = vmatpush3.bf16.msra.mxu1 %v7249_v26 }
 0x14b   : > { %5004 = vmatprep.subr.bf16.mxu1 %v7250_v2 }
 0x14e   : > { %5006 = vmatpush3.bf16.msra.mxu1 %v7251_v45 }
 0x14f   : > { %5008 = vmatprep.subr.bf16.mxu1 %v7252_v55 }
 0x152   : > { %5010 = vmatpush3.bf16.msra.mxu1 %v5943_v60 }
 0x153   : > { %5044 = vmatprep.subr.bf16.mxu1 %v5973_v22  ;;  %v390_v22 = vsub.f32 %v7255_v5, %v388_v41 }
 0x155   : > { %2023 = vmatmul.mubr.f32.vlgmr.msra.gmra.mrb[6].mxu1 %v6115_v8  ;;  %v6357_v8 = vmul.f32 0.00390625, %v390_v22 }
 0x156   : > { %5046 = vmatpush3.bf16.msra.mxu1 %v6144_v14  ;;  %2365 = vmatprep.mubr.f32.mxu1 %v6342_v24  ;;  %v1152_v14 = vadd.f32 %v1151_v49, %v6100_v59  ;;  %v417_v59 = vmul.f32 %v6359_v27, %v6359_v27  ;;  %v407_v49 = vmul.f32 0.00390625, %v391_v38 }
 0x157   : > { %5048 = vmatprep.subr.bf16.mxu1 %v6166_v15  ;;  %v7257_v15 = vld [vmem:[#allocation45_spill] sm:$0xff] }
 0x158   : > { %v421_v22 = vmul.f32 1.0039216, %v417_v59  ;;  %v419_v56 = vmul.f32 %v407_v49, %v407_v49 }
 0x15a   : > { %5050 = vmatpush3.bf16.msra.mxu1 %v6180_v50  ;;  %v392_v50 = vsub.f32 %v7257_v15, %v388_v41 }
 0x15b   : > { %5052 = vmatprep.subr.bf16.mxu1 %v6199_v0  ;;  %v1153_v0 = vrot.slane %v1152_v14, 2 }
 0x15e   : > { %5054 = vmatpush3.bf16.msra.mxu1 %v6201_v29  ;;  %v418_v29 = vmul.f32 %v6357_v8, %v6357_v8 }
 0x15f   : > { %5056 = vmatprep.subr.bf16.mxu1 %v6219_v11  ;;  %v408_v11 = vmul.f32 0.00390625, %v392_v50 }
 0x160   : > { %v422_v5 = vmul.f32 1.0039216, %v418_v29 }
 0x162   : > { %5058 = vmatpush3.bf16.msra.mxu1 %v6230_v35  ;;  %v1154_v35 = vadd.f32 %v1153_v0, %v1152_v14  ;;  %v423_v14 = vmul.f32 1.0039216, %v419_v56  ;;  %v336_v56 = vld [vmem:[%s7020_s5 + $0x8] sm:$0xff] }
 0x163   : > { %5060 = vmatprep.subr.bf16.mxu1 %v6232_v4  ;;  %v420_v4 = vmul.f32 %v408_v11, %v408_v11 }
 0x164   : > { %v1155_v42 = vrot.slane %v1154_v35, 1 }
 0x166   : > { %5062 = vmatpush3.bf16.msra.mxu1 %v6245_v54 }
 0x167   : > { %5064 = vmatprep.subr.bf16.mxu1 %v6247_v9 }
 0x168   : > { %v398_v61 = vpop.xlane.xlu1 %397  ;;  %v395_v41 = vpop.xlane.xlu0 %394 }
 0x169   : > { %v414_v57 = vmul.f32 0.003921569, %v398_v61  ;;  %v413_v32 = vmul.f32 0.003921569, %v395_v41  ;;  %v424_v61 = vmul.f32 1.0039216, %v420_v4  ;;  %v411_v4 = vadd.f32 %v407_v49, %v6082_v44 }
 0x16a   : > { %5066 = vmatpush3.bf16.msra.mxu1 %v6265_v31  ;;  %v6375_v31 = vadd.f32 %v1155_v42, %v1154_v35  ;;  %v412_v35 = vadd.f32 %v408_v11, %v6082_v44 }
 0x16b   : > { %v426_v15 = vsub.f32 %v414_v57, %v422_v5  ;;  %v425_v17 = vsub.f32 %v413_v32, %v421_v22  ;;  %5068 = vmatprep.subr.bf16.mxu1 %v6275_v34  ;;  %v461_v5 = vstv %s340_s8  ;;  %v338_v57 = vld [vmem:[%s7020_s5 + $0x18] sm:$0xff]  ;;  %v410_v22 = vadd.f32 %v6357_v8, %v6082_v44 }
 0x16c   : > { %v404_v43 = vpop.xlane.xlu1 %403  ;;  %v401_v54 = vpop.xlane.xlu0 %400  ;;  %v6393_v42 = vand.u32 4294901760, %v6375_v31  ;;  %v409_v32 = vadd.f32 %v6359_v27, %v6082_v44  ;;  %v465_v49 = vmul.f32 %v461_v5, %v412_v35  ;;  %v464_v37 = vmul.f32 %v461_v5, %v411_v4 }
 0x16d   : > { %v430_v50 = vmax.f32 %v426_v15, 0.0  ;;  %v416_v38 = vmul.f32 0.003921569, %v404_v43  ;;  %v429_v9 = vmax.f32 %v425_v17, 0.0  ;;  %v415_v29 = vmul.f32 0.003921569, %v401_v54 }
 0x16e   : > { %5070 = vmatpush3.bf16.msra.mxu1 %v6278_v63  ;;  %v6378_v43 = vsub.f32 %v1165_v62, %v6342_v24  ;;  %v337_v63 = vld [vmem:[%s7020_s5 + $0x10] sm:$0xff]  ;;  %7260 = vst [vmem:[#allocation10_spill] sm:$0xff] %v6393_v42 }
 0x16f   : > { %5385 = vrsqrt.f32 %v430_v50  ;;  %v428_v0 = vsub.f32 %v416_v38, %v424_v61  ;;  %v427_v59 = vsub.f32 %v415_v29, %v423_v14  ;;  %5072 = vmatprep.subr.bf16.mxu1 %v6281_v1  ;;  %v483_v62 = vsel %vm475_vm0, %v337_v63, 0 }
 0x170   : > { %5387 = vrsqrt.f32 %v429_v9  ;;  %7259 = vst [vmem:[#allocation9_spill] sm:$0xff] %v6378_v43  ;;  %v7146_v1 = vand.u32 4294901760, %v6378_v43  ;;  %v466_v38 = vstv %s4110_s9  ;;  %v6416_v61 = vand.u32 4294901760, %v483_v62  ;;  %s6956_s9 = scalar_lea.hbm %s7022_s7, %s4122_s21 }
 0x171   : > { %v6380_v34 = vmax.f32 %v428_v0, 0.0  ;;  %v6382_v17 = vmax.f32 %v427_v59, 0.0  ;;  %vm442_vm1 = vcmp.eq.f32.partialorder %v430_v50, inf  ;;  %v445_v14 = vand.u32 2147483648, %v430_v50 }
 0x172   : > { %5074 = vmatpush3.bf16.msra.mxu1 %v6290_v47  ;;  %v480_v47 = vsel %vm475_vm0, %v336_v56, 0  ;;  %v486_v0 = vsel %vm475_vm0, %v338_v57, 0  ;;  %vm444_vm2 = vcmp.eq.f32.partialorder %v430_v50, 0.0  ;;  %vm435_vm3 = vcmp.eq.f32.partialorder %v429_v9, inf }
 0x173   : > { %5389 = vrsqrt.f32 %v6380_v34  ;;  %5108 = vmatprep.subr.bf16.mxu1 %v5687_v20  ;;  %v6414_v29 = vand.u32 4294901760, %v480_v47  ;;  %v438_v27 = vand.u32 2147483648, %v429_v9  ;;  %vm437_vm4 = vcmp.eq.f32.partialorder %v429_v9, 0.0 }
 0x174   : > { %5391 = vrsqrt.f32 %v6382_v17  ;;  %v463_v63 = vmul.f32 %v461_v5, %v410_v22  ;;  %vm456_vm5 = vcmp.eq.f32.partialorder %v6380_v34, inf  ;;  %vm458_vm6 = vcmp.eq.f32.partialorder %v6380_v34, 0.0 }
 0x175   : > { %2367 = vmatmul.mubr.f32.vlgmr.msra.gmra.mrb[8].mxu1 %v6393_v42  ;;  %v6422_v57 = vsub.f32 %v480_v47, %v6414_v29  ;;  %vm449_vm7 = vcmp.eq.f32.partialorder %v6382_v17, inf  ;;  %vm451_vm8 = vcmp.eq.f32.partialorder %v6382_v17, 0.0 }
 0x176   : > { %5110 = vmatpush3.bf16.msra.mxu1 %v5693_v21  ;;  %2609 = vmatprep.mubr.f32.mxu1 %v7146_v1  ;;  %v462_v1 = vmul.f32 %v461_v5, %v409_v32 }
 0x177   : > { %5112 = vmatprep.subr.bf16.mxu1 %v5725_v30 }
 0x179   : > { %v5386_v41 = vpop.eup %5385 }
 0x17a   : > { %v5388_v15 = vpop.eup %5387  ;;  %v441_v54 = vmul.f32 %v5386_v41, %v430_v50  ;;  %5114 = vmatpush3.bf16.msra.mxu1 %v7241_v40 }
 0x17b   : > { %v434_v11 = vmul.f32 %v5388_v15, %v429_v9  ;;  %5116 = vmatprep.subr.bf16.mxu1 %v7242_v58 }
 0x17c   : > { %v443_v8 = vsel %vm442_vm1, %v430_v50, %v441_v54  ;;  %v6424_v50 = vand.u32 4294901760, %v486_v0 }
 0x17d   : > { %v446_v59 = vsel %vm444_vm2, %v445_v14, %v443_v8  ;;  %v436_v56 = vsel %vm435_vm3, %v429_v9, %v434_v11  ;;  %v5390_v43 = vpop.eup %5389  ;;  %v6430_v9 = vsub.f32 %v483_v62, %v6416_v61  ;;  %v569_v8 = vand.u32 4294901760, %v6422_v57 }
 0x17e   : > { %v468_v41 = vmul.f32 %v466_v38, %v446_v59  ;;  %v439_v44 = vsel %vm437_vm4, %v438_v27, %v436_v56  ;;  %v5392_v54 = vpop.eup %5391  ;;  %v455_v35 = vmul.f32 %v5390_v43, %v6380_v34  ;;  %5118 = vmatpush3.bf16.msra.mxu1 %v7243_v16  ;;  %v452_v43 = vand.u32 2147483648, %v6382_v17 }
 0x17f   : > { %v467_v15 = vmul.f32 %v466_v38, %v439_v44  ;;  %v459_v44 = vand.u32 2147483648, %v6380_v34  ;;  %v448_v47 = vmul.f32 %v5392_v54, %v6382_v17  ;;  %5120 = vmatprep.subr.bf16.mxu1 %v7244_v33 }
 0x180   : > { %v472_v36 = vadd.f32 %v468_v41, %v463_v63  ;;  %v457_v32 = vsel %vm456_vm5, %v6380_v34, %v455_v35  ;;  %v6451_v63 = vsub.f32 %v486_v0, %v6424_v50 }
 0x181   : > { %v471_v22 = vadd.f32 %v467_v15, %v462_v1  ;;  %v460_v14 = vsel %vm458_vm6, %v459_v44, %v457_v32  ;;  %v450_v62 = vsel %vm449_vm7, %v6382_v17, %v448_v47  ;;  %v579_v15 = vand.u32 4294901760, %v6430_v9 }
 0x182   : > { %v492_v5 = vand.u32 4294901760, %v472_v36  ;;  %v470_v1 = vmul.f32 %v466_v38, %v460_v14  ;;  %v453_v11 = vsel %vm451_vm8, %v452_v43, %v450_v62  ;;  %5122 = vmatpush3.bf16.msra.mxu1 %v7245_v18 }
 0x183   : > { %v489_v4 = vand.u32 4294901760, %v471_v22  ;;  %v469_v34 = vmul.f32 %v466_v38, %v453_v11  ;;  %5124 = vmatprep.subr.bf16.mxu1 %v7246_v48  ;;  %v580_v47 = vsub.f32 %v6430_v9, %v579_v15 }
 0x184   : > { %v6443_v27 = vsub.f32 %v472_v36, %v492_v5  ;;  %v474_v41 = vadd.f32 %v470_v1, %v465_v49 }
 0x185   : > { %v6445_v59 = vpack.c.bf16 %v492_v5, %v489_v4  ;;  %v6448_v56 = vsub.f32 %v471_v22, %v489_v4  ;;  %v473_v54 = vadd.f32 %v469_v34, %v464_v37  ;;  %v570_v37 = vsub.f32 %v6422_v57, %v569_v8 }
 0x186   : > { %v607_v17 = vand.u32 4294901760, %v6443_v27  ;;  %v498_v35 = vand.u32 4294901760, %v474_v41  ;;  %5126 = vmatpush3.bf16.msra.mxu1 %v7247_v6  ;;  %v589_v22 = vand.u32 4294901760, %v6451_v63 }
 0x187   : > { %4772 = vmatprep.subr.bf16.mxu0 %v6445_v59  ;;  %v600_v36 = vand.u32 4294901760, %v6448_v56  ;;  %v495_v0 = vand.u32 4294901760, %v473_v54  ;;  %5128 = vmatprep.subr.bf16.mxu1 %v7248_v52  ;;  %v571_v62 = vand.u32 4294901760, %v570_v37 }
 0x188   : > { %4774 = vmatpush3.bf16.msra.mxu0 %v6445_v59  ;;  %v608_v38 = vsub.f32 %v6443_v27, %v607_v17  ;;  %v6473_v5 = vsub.f32 %v474_v41, %v498_v35  ;;  %v590_v11 = vsub.f32 %v6451_v63, %v589_v22  ;;  %v581_v41 = vand.u32 4294901760, %v580_v47 }
 0x189   : > { %v601_v49 = vsub.f32 %v6448_v56, %v600_v36  ;;  %v6475_v32 = vpack.c.bf16 %v498_v35, %v495_v0  ;;  %v6477_v4 = vsub.f32 %v473_v54, %v495_v0  ;;  %v6493_v0 = vsub.f32 %v6375_v31, %v6393_v42 }
 0x18a   : > { %v609_v44 = vand.u32 4294901760, %v608_v38  ;;  %5130 = vmatpush3.bf16.msra.mxu1 %v7249_v26  ;;  %v621_v14 = vand.u32 4294901760, %v6473_v5  ;;  %v591_v37 = vand.u32 4294901760, %v590_v11  ;;  %v7278_v11 = vld [vmem:[#allocation30_spill] sm:$0xff] }
 0x18b   : > { %v602_v43 = vand.u32 4294901760, %v601_v49  ;;  %4776 = vmatprep.subr.bf16.mxu0 %v6475_v32  ;;  %5132 = vmatprep.subr.bf16.mxu1 %v7250_v2  ;;  %v614_v34 = vand.u32 4294901760, %v6477_v4  ;;  %v7154_v47 = vand.u32 4294901760, %v6493_v0  ;;  %v4791_v31 = vpack.c.bf16 %v6473_v5, %v6477_v4 }
 0x18c   : > { %4778 = vmatpush3.bf16.msra.mxu0 %v6475_v32  ;;  %v622_v54 = vsub.f32 %v6473_v5, %v621_v14  ;;  %v4803_v5 = vpack.c.bf16 %v607_v17, %v600_v36  ;;  %v7269_v17 = vld [vmem:[#allocation24_spill] sm:$0xff] }
 0x18d   : > { %v4779_v1 = vpack.c.bf16 %v609_v44, %v602_v43  ;;  %v615_v35 = vsub.f32 %v6477_v4, %v614_v34  ;;  %v4787_v43 = vpack.c.bf16 %v6443_v27, %v6448_v56  ;;  %v7261_v4 = vand.u32 4294901760, %v6294_v10 }
 0x18e   : > { %5134 = vmatpush3.bf16.msra.mxu1 %v7251_v45  ;;  %v623_v38 = vand.u32 4294901760, %v622_v54  ;;  %v6566_v27 = vpack.c.bf16 %v5960_v46, %v5955_v28 }
 0x18f   : > { %4780 = vmatprep.subr.bf16.mxu0 %v4779_v1  ;;  %4630 = vmatmul.mubr.f32.vlgmr.msra.gmra.mrb[0].mxu0 %v571_v62  ;;  %v616_v49 = vand.u32 4294901760, %v615_v35  ;;  %v4807_v62 = vpack.c.bf16 %v621_v14, %v614_v34  ;;  %v7276_v14 = vld [vmem:[#allocation29_spill] sm:$0xff]  ;;  %v7279_v34 = vld [vmem:[#allocation31_spill] sm:$0xff] }
 0x190   : > { %5136 = vmatprep.subr.bf16.mxu1 %v7252_v55  ;;  %4782 = vmatpush3.bf16.msra.mxu0 %v4779_v1 }
 0x191   : > { %4632 = vmatprep.mubr.f32.mxu0 %v581_v41  ;;  %v4783_v44 = vpack.c.bf16 %v623_v38, %v616_v49  ;;  %v6610_v41 = vpack.c.bf16 %v7279_v34, %v7278_v11  ;;  %v7281_v38 = vld [vmem:[#allocation32_spill] sm:$0xff] }
 0x192   : > { %5138 = vmatpush3.bf16.msra.mxu1 %v5943_v60 }
 0x193   : > { %4633 = vmatmul.mubr.f32.gmra.mrb[2].mxu0 %v591_v37  ;;  %4784 = vmatprep.subr.bf16.mxu0 %v4783_v44  ;;  %7280 = vst [vmem:[#allocation17_spill] sm:$0xff] %v6610_v41  ;;  %v7282_v37 = vld [vmem:[#allocation33_spill] sm:$0xff] }
 0x194   : > { %4786 = vmatpush3.bf16.msra.mxu0 %v4783_v44  ;;  %5172 = vmatprep.subr.bf16.mxu1 %v5687_v20  ;;  %v6615_v49 = vpack.c.bf16 %v7282_v37, %v7281_v38 }
 0x195   : > { %2613 = vmatmul.mubr.f32.vlgmr.msra.gmra.mrb[10].mxu1 %v7154_v47  ;;  %4788 = vmatprep.subr.bf16.mxu0 %v4787_v43 }
 0x196   : > { %5174 = vmatpush3.bf16.msra.mxu1 %v5693_v21  ;;  %2883 = vmatprep.mubr.f32.mxu1 %v6342_v24  ;;  %7283 = vst [vmem:[#allocation18_spill] sm:$0xff] %v6615_v49  ;;  %v7291_v24 = vld [vmem:[#allocation39_spill] sm:$0xff] }
 0x197   : > { %4643 = vmatprep.mubr.f32.mxu0 %v6287_v53  ;;  %5176 = vmatprep.subr.bf16.mxu1 %v5725_v30 }
 0x198   : > { %4644 = vmatmul.mubr.f32.vlgmr.msra.gmra.mrb[0].mxu0 %v6414_v29 }
 0x199   : > { %4790 = vmatpush3.bf16.msra.mxu0 %v4787_v43  ;;  %4646 = vmatprep.mubr.f32.mxu0 %v6416_v61  ;;  %v7284_v43 = vld [vmem:[#allocation34_spill] sm:$0xff] }
 0x19a   : > { %4792 = vmatprep.subr.bf16.mxu0 %v4791_v31  ;;  %5178 = vmatpush3.bf16.msra.mxu1 %v7241_v40 }
 0x19b   : > { %5180 = vmatprep.subr.bf16.mxu1 %v7242_v58 }
 0x19c   : > { %4647 = vmatmul.mubr.f32.gmra.mrb[2].mxu0 %v6424_v50 }
 0x19d   : > { %4794 = vmatpush3.bf16.msra.mxu0 %v4791_v31  ;;  %4657 = vmatprep.mubr.f32.mxu0 %v6294_v10  ;;  %v7262_v10 = vld [vmem:[#allocation20_spill] sm:$0xff]  ;;  %v7285_v31 = vld [vmem:[#allocation35_spill] sm:$0xff] }
 0x19e   : > { %4796 = vmatprep.subr.bf16.mxu0 %v6445_v59  ;;  %5182 = vmatpush3.bf16.msra.mxu1 %v7243_v16 }
 0x19f   : > { %5184 = vmatprep.subr.bf16.mxu1 %v7244_v33 }
 0x1a0   : > { %4658 = vmatmul.mubr.f32.vlgmr.msra.gmra.mrb[0].mxu0 %v6422_v57  ;;  %v7263_v57 = vld [vmem:[#allocation21_spill] sm:$0xff] }
 0x1a1   : > { %4798 = vmatpush3.bf16.msra.mxu0 %v6445_v59  ;;  %4660 = vmatprep.mubr.f32.mxu0 %v6430_v9  ;;  %v6553_v9 = vpack.c.bf16 %v7263_v57, %v7262_v10 }
 0x1a2   : > { %4800 = vmatprep.subr.bf16.mxu0 %v6475_v32  ;;  %5186 = vmatpush3.bf16.msra.mxu1 %v7245_v18 }
 0x1a3   : > { %5188 = vmatprep.subr.bf16.mxu1 %v7246_v48 }
 0x1a4   : > { %4661 = vmatmul.mubr.f32.gmra.mrb[2].mxu0 %v6451_v63 }
 0x1a5   : > { %4802 = vmatpush3.bf16.msra.mxu0 %v6475_v32  ;;  %4671 = vmatprep.mubr.f32.mxu0 %v7261_v4  ;;  %v7287_v4 = vld [vmem:[#allocation36_spill] sm:$0xff] }
 0x1a6   : > { %4804 = vmatprep.subr.bf16.mxu0 %v4803_v5  ;;  %5190 = vmatpush3.bf16.msra.mxu1 %v7247_v6 }
 0x1a7   : > { %5192 = vmatprep.subr.bf16.mxu1 %v7248_v52 }
 0x1a8   : > { %4672 = vmatmul.mubr.f32.vlgmr.msra.gmra.mrb[0].mxu0 %v569_v8  ;;  %v6560_v8 = vpack.c.bf16 %v5938_v25, %v5933_v39 }
 0x1a9   : > { %4806 = vmatpush3.bf16.msra.mxu0 %v4803_v5  ;;  %4674 = vmatprep.mubr.f32.mxu0 %v579_v15  ;;  %v7270_v15 = vld [vmem:[#allocation25_spill] sm:$0xff]  ;;  %v6620_v5 = vpack.c.bf16 %v7285_v31, %v7284_v43 }
 0x1aa   : > { %4808 = vmatprep.subr.bf16.mxu0 %v4807_v62  ;;  %5194 = vmatpush3.bf16.msra.mxu1 %v7249_v26  ;;  %v6595_v36 = vpack.c.bf16 %v7270_v15, %v7269_v17 }
 0x1ab   : > { %5196 = vmatprep.subr.bf16.mxu1 %v7250_v2  ;;  %7286 = vst [vmem:[#allocation19_spill] sm:$0xff] %v6620_v5 }
 0x1ac   : > { %4675 = vmatmul.mubr.f32.gmra.mrb[2].mxu0 %v589_v22  ;;  %7271 = vst [vmem:[#allocation14_spill] sm:$0xff] %v6595_v36 }
 0x1ad   : > { %4810 = vmatpush3.bf16.msra.mxu0 %v4807_v62  ;;  %4685 = vmatprep.mubr.f32.mxu0 %v6287_v53  ;;  %v7288_v62 = vld [vmem:[#allocation37_spill] sm:$0xff] }
 0x1ae   : > { %4812 = vmatprep.subr.bf16.mxu0 %v6445_v59  ;;  %5198 = vmatpush3.bf16.msra.mxu1 %v7251_v45  ;;  %v6625_v47 = vpack.c.bf16 %v7288_v62, %v7287_v4 }
 0x1af   : > { %5200 = vmatprep.subr.bf16.mxu1 %v7252_v55 }
 0x1b0   : > { %4686 = vmatmul.mubr.f32.vlgmr.msra.gmra.mrb[0].mxu0 %v6414_v29  ;;  %7289 = vst [vmem:[#allocation44_spill] sm:$0xff] %v6625_v47 }
 0x1b1   : > { %4814 = vmatpush3.bf16.msra.mxu0 %v6445_v59  ;;  %4688 = vmatprep.mubr.f32.mxu0 %v6416_v61  ;;  %v6573_v59 = vpack.c.bf16 %v5970_v51, %v5965_v7 }
 0x1b2   : > { %4816 = vmatprep.subr.bf16.mxu0 %v6475_v32  ;;  %5202 = vmatpush3.bf16.msra.mxu1 %v5943_v60 }
 0x1b4   : > { %4689 = vmatmul.mubr.f32.gmra.mrb[2].mxu0 %v6424_v50 }
 0x1b5   : > { %4818 = vmatpush3.bf16.msra.mxu0 %v6475_v32  ;;  %2885 = vmatmul.mubr.f32.vlgmr.msra.gmra.mrb[12].mxu1 %v6393_v42  ;;  %v7275_v32 = vld [vmem:[#allocation28_spill] sm:$0xff]  ;;  %v7290_v42 = vld [vmem:[#allocation38_spill] sm:$0xff] }
 0x1b6   : > { %4699 = vmatprep.mubr.f32.mxu0 %v6287_v53  ;;  %4884 = vmatprep.subr.bf16.mxu0 %v6553_v9  ;;  %v7264_v53 = vld [vmem:[#allocation22_spill] sm:$0xff]  ;;  %v6605_v1 = vpack.c.bf16 %v7276_v14, %v7275_v32 }
 0x1b7   : > { %v6578_v56 = vpack.c.bf16 %v7264_v53, %v5978_v23 }
 0x1b8   : > { %4700 = vmatmul.mubr.f32.vlgmr.msra.gmra.mrb[0].mxu0 %v6414_v29  ;;  %v7266_v29 = vld [vmem:[#allocation23_spill] sm:$0xff]  ;;  %7277 = vst [vmem:[#allocation16_spill] sm:$0xff] %v6605_v1 }
 0x1b9   : > { %4886 = vmatpush3.bf16.msra.mxu0 %v6560_v8  ;;  %4702 = vmatprep.mubr.f32.mxu0 %v6416_v61  ;;  %7265 = vst [vmem:[#allocation11_spill] sm:$0xff] %v6578_v56  ;;  %v6585_v63 = vpack.c.bf16 %v5994_v3, %v7266_v29  ;;  %v6590_v61 = vpack.c.bf16 %v6004_v13, %v5999_v12 }
 0x1ba   : > { %4888 = vmatprep.subr.bf16.mxu0 %v6566_v27 }
 0x1bb   : > { %7267 = vst [vmem:[#allocation12_spill] sm:$0xff] %v6585_v63  ;;  %7268 = vst [vmem:[#allocation13_spill] sm:$0xff] %v6590_v61 }
 0x1bc   : > { %4703 = vmatmul.mubr.f32.gmra.mrb[2].mxu0 %v6424_v50  ;;  %v7272_v50 = vld [vmem:[#allocation26_spill] sm:$0xff] }
 0x1bd   : > { %4890 = vmatpush3.bf16.msra.mxu0 %v6573_v59  ;;  %1640 = vmatprep.mubr.f32.mxu0 %v6132_v19  ;;  %v7273_v19 = vld [vmem:[#allocation27_spill] sm:$0xff] }
 0x1be   : > { %4892 = vmatprep.subr.bf16.mxu0 %v6578_v56  ;;  %v6600_v22 = vpack.c.bf16 %v7273_v19, %v7272_v50 }
 0x1c0   : > { %7274 = vst [vmem:[#allocation15_spill] sm:$0xff] %v6600_v22 }
 0x1c1   : > { %4894 = vmatpush3.bf16.msra.mxu0 %v6585_v63 }
 0x1c2   : > { %4896 = vmatprep.subr.bf16.mxu0 %v6590_v61  ;;  %v7298_v61 = vand.u32 4294901760, %v5938_v25  ;;  %v7304_v25 = vand.u32 4294901760, %v5970_v51  ;;  %v7309_v51 = vand.u32 4294901760, %v5999_v12  ;;  %v7315_v12 = vand.u32 4294901760, %v7275_v32 }
 0x1c3   : > { %v7320_v32 = vand.u32 4294901760, %v7282_v37 }
 0x1c5   : > { %4898 = vmatpush3.bf16.msra.mxu0 %v6595_v36 }
 0x1c6   : > { %4900 = vmatprep.subr.bf16.mxu0 %v6600_v22  ;;  %v7296_v22 = vand.u32 4294901760, %v7263_v57  ;;  %v7302_v57 = vld [vmem:[#allocation48_spill] sm:$0xff] }
 0x1c8   : > { %v4203_v54 = vpop.f32.mrb[0].mxu1 }
 0x1c9   : > { %4902 = vmatpush3.bf16.msra.mxu0 %v6605_v1  ;;  %v4204_v35 = vpop.f32.mrb[1].mxu1  ;;  %v6630_v1 = vpack.c.bf16 %v7291_v24, %v7290_v42 }
 0x1ca   : > { %v4205_v44 = vadd.f32 %v4204_v35, %v4203_v54  ;;  %4904 = vmatprep.subr.bf16.mxu0 %v6610_v41  ;;  %v7293_v54 = vld [vmem:[#allocation40_spill] sm:$0xff]  ;;  %v7294_v35 = vld [vmem:[#allocation41_spill] sm:$0xff] }
 0x1cb   : > { %7292 = vst [vmem:[#allocation42_spill] sm:$0xff] %v6630_v1  ;;  %v6635_v41 = vpack.c.bf16 %v7294_v35, %v7293_v54 }
 0x1cd   : > { %4906 = vmatpush3.bf16.msra.mxu0 %v6615_v49  ;;  %v7295_v49 = vand.u32 4294901760, %v7262_v10  ;;  %v7301_v10 = vld [vmem:[#allocation49_spill] sm:$0xff] }
 0x1ce   : > { %4908 = vmatprep.subr.bf16.mxu0 %v6620_v5  ;;  %v7297_v5 = vand.u32 4294901760, %v5933_v39  ;;  %v7303_v39 = vand.u32 4294901760, %v5965_v7  ;;  %v7310_v7 = vand.u32 4294901760, %v6004_v13  ;;  %v7316_v13 = vand.u32 4294901760, %v7276_v14 }
 0x1cf   : > { %v6642_v36 = vpack.c.bf16 %v7296_v22, %v7295_v49  ;;  %v7307_v22 = vand.u32 4294901760, %v7266_v29  ;;  %v7314_v29 = vand.u32 4294901760, %v7273_v19 }
 0x1d0   : > { %v6649_v63 = vpack.c.bf16 %v7298_v61, %v7297_v5  ;;  %v6665_v61 = vpack.c.bf16 %v7304_v25, %v7303_v39  ;;  %v6686_v5 = vpack.c.bf16 %v7310_v7, %v7309_v51  ;;  %v6707_v39 = vpack.c.bf16 %v7316_v13, %v7315_v12 }
 0x1d1   : > { %4910 = vmatpush3.bf16.msra.mxu0 %v6625_v47  ;;  %v7299_v47 = vand.u32 4294901760, %v5955_v28  ;;  %v7305_v28 = vand.u32 4294901760, %v5978_v23  ;;  %v7311_v23 = vand.u32 4294901760, %v7269_v17  ;;  %v7317_v17 = vand.u32 4294901760, %v7278_v11 }
 0x1d2   : > { %4912 = vmatprep.subr.bf16.mxu0 %v6630_v1  ;;  %v7300_v1 = vand.u32 4294901760, %v5960_v46  ;;  %v7306_v46 = vand.u32 4294901760, %v7264_v53  ;;  %v7312_v53 = vand.u32 4294901760, %v7270_v15  ;;  %v7318_v15 = vand.u32 4294901760, %v7279_v34 }
 0x1d3   : > { %v7322_v11 = vand.u32 4294901760, %v7285_v31  ;;  %v7323_v51 = vand.u32 4294901760, %v7287_v4  ;;  %v7325_v7 = vand.u32 4294901760, %v7290_v42  ;;  %v7328_v31 = vand.u32 4294901760, %v7294_v35  ;;  %v7329_v4 = vld [vmem:[#allocation9_spill] sm:$0xff]  ;;  %v7331_v42 = vld [vmem:[#allocation47_spill] sm:$0xff] }
 0x1d4   : > { %v6656_v56 = vpack.c.bf16 %v7300_v1, %v7299_v47  ;;  %v6672_v47 = vpack.c.bf16 %v7306_v46, %v7305_v28  ;;  %v7308_v1 = vand.u32 4294901760, %v5994_v3  ;;  %v7313_v3 = vand.u32 4294901760, %v7272_v50  ;;  %v7344_v35 = vld [vmem:[#allocation8_spill] sm:$0xff] }
 0x1d5   : > { %4914 = vmatpush3.bf16.msra.mxu0 %v6635_v41  ;;  %v6714_v25 = vpack.c.bf16 %v7318_v15, %v7317_v17  ;;  %v7319_v28 = vand.u32 4294901760, %v7281_v38  ;;  %v7324_v38 = vand.u32 4294901760, %v7288_v62  ;;  %v7330_v62 = vand.u32 4294901760, %v7329_v4 }
 0x1d6   : > { %4948 = vmatprep.subr.bf16.mxu0 %v6642_v36  ;;  %v6679_v49 = vpack.c.bf16 %v7308_v1, %v7307_v22  ;;  %v7321_v22 = vand.u32 4294901760, %v7284_v43  ;;  %v7326_v43 = vand.u32 4294901760, %v7291_v24 }
 0x1d7   : > { %v6721_v46 = vpack.c.bf16 %v7320_v32, %v7319_v28  ;;  %v6737_v37 = vpack.c.bf16 %v7324_v38, %v7323_v51 }
 0x1d8   : > { %1643 = vmatmul.mubr.f32.vlgmr.msra.gmra.mrb[4].mxu0 %v7301_v10  ;;  %v6693_v10 = vpack.c.bf16 %v7312_v53, %v7311_v23  ;;  %v6728_v34 = vpack.c.bf16 %v7322_v11, %v7321_v22  ;;  %v6744_v23 = vpack.c.bf16 %v7326_v43, %v7325_v7 }
 0x1d9   : > { %4950 = vmatpush3.bf16.msra.mxu0 %v6649_v63  ;;  %1917 = vmatprep.mubr.f32.mxu0 %v7302_v57  ;;  %v6700_v57 = vpack.c.bf16 %v7314_v29, %v7313_v3  ;;  %v2127_v3 = vsub.f32 %v7329_v4, %v7330_v62 }
 0x1da   : > { %4952 = vmatprep.subr.bf16.mxu0 %v6656_v56 }
 0x1db   : > { %v2128_v24 = vand.u32 4294901760, %v2127_v3 }
 0x1dd   : > { %4954 = vmatpush3.bf16.msra.mxu0 %v6665_v61 }
 0x1de   : > { %4956 = vmatprep.subr.bf16.mxu0 %v6672_v47 }
 0x1e1   : > { %4958 = vmatpush3.bf16.msra.mxu0 %v6679_v49 }
 0x1e2   : > { %4960 = vmatprep.subr.bf16.mxu0 %v6686_v5 }
 0x1e5   : > { %4962 = vmatpush3.bf16.msra.mxu0 %v6693_v10 }
 0x1e6   : > { %4964 = vmatprep.subr.bf16.mxu0 %v6700_v57 }
 0x1e8   : > { %v4238_v50 = vpop.f32.mrb[2].mxu1 }
 0x1e9   : > { %v4239_v19 = vpop.f32.mrb[3].mxu1  ;;  %4966 = vmatpush3.bf16.msra.mxu0 %v6707_v39 }
 0x1ea   : > { %v4240_v14 = vadd.f32 %v4239_v19, %v4238_v50  ;;  %4968 = vmatprep.subr.bf16.mxu0 %v6714_v25 }
 0x1ec   : > { %v6730_v1 = vadd.f32 %v4240_v14, %v4205_v44  ;;  %v7327_v44 = vand.u32 4294901760, %v7293_v54 }
 0x1ed   : > { %4970 = vmatpush3.bf16.msra.mxu0 %v6721_v46 }
 0x1ee   : > { %4972 = vmatprep.subr.bf16.mxu0 %v6728_v34  ;;  %v6751_v53 = vpack.c.bf16 %v7328_v31, %v7327_v44 }
 0x1f1   : > { %4974 = vmatpush3.bf16.msra.mxu0 %v6737_v37 }
 0x1f2   : > { %4976 = vmatprep.subr.bf16.mxu0 %v6744_v23 }
 0x1f5   : > { %4978 = vmatpush3.bf16.msra.mxu0 %v6751_v53 }
 0x1f6   : > { %5012 = vmatprep.subr.bf16.mxu0 %v5687_v20 }
 0x1f8   : > { %1919 = vmatmul.mubr.f32.vlgmr.msra.gmra.mrb[6].mxu0 %v7331_v42  ;;  %v332_v42 = vld [vmem:[%s7019_s4 + $0x8] sm:$0xff] }
 0x1f9   : > { %5014 = vmatpush3.bf16.msra.mxu0 %v5693_v21  ;;  %2129 = vmatprep.mubr.f32.mxu0 %v2128_v24  ;;  %v331_v24 = vld [vmem:[%s7019_s4] sm:$0xff] }
 0x1fa   : > { %5016 = vmatprep.subr.bf16.mxu0 %v5725_v30  ;;  %v7332_v30 = vand.u32 4294901760, %v6493_v0 }
 0x1fd   : > { %5018 = vmatpush3.bf16.msra.mxu0 %v7241_v40  ;;  %v2133_v40 = vsub.f32 %v6493_v0, %v7332_v30  ;;  %v2927_v30 = vand.u32 4294901760, %v332_v42 }
 0x1fe   : > { %5020 = vmatprep.subr.bf16.mxu0 %v7242_v58 }
 0x1ff   : > { %v2134_v58 = vand.u32 4294901760, %v2133_v40 }
 0x201   : > { %5022 = vmatpush3.bf16.msra.mxu0 %v7243_v16  ;;  %v7335_v16 = vld [vmem:[#allocation13_spill] sm:$0xff] }
 0x202   : > { %5024 = vmatprep.subr.bf16.mxu0 %v7244_v33  ;;  %v7337_v33 = vld [vmem:[#allocation15_spill] sm:$0xff] }
 0x205   : > { %5026 = vmatpush3.bf16.msra.mxu0 %v7245_v18 }
 0x206   : > { %5028 = vmatprep.subr.bf16.mxu0 %v7246_v48 }
 0x208   : > { %v4308_v20 = vpop.f32.mrb[4].mxu1 }
 0x209   : > { %v4309_v54 = vpop.f32.mrb[5].mxu1  ;;  %5030 = vmatpush3.bf16.msra.mxu0 %v7247_v6  ;;  %v7338_v6 = vld [vmem:[#allocation16_spill] sm:$0xff] }
 0x20a   : > { %v6769_v21 = vadd.f32 %v4309_v54, %v4308_v20  ;;  %5032 = vmatprep.subr.bf16.mxu0 %v7248_v52  ;;  %v7333_v52 = vld [vmem:[#allocation11_spill] sm:$0xff]  ;;  %v333_v20 = vld [vmem:[%s7019_s4 + $0x10] sm:$0xff]  ;;  %v5508_v54 = vmov 0.0|0.0  }
 0x20b   : > { %v2930_v40 = vand.u32 4294901760, %v333_v20 }
 0x20d   : > { %5034 = vmatpush3.bf16.msra.mxu0 %v7249_v26 }
 0x20e   : > { %5036 = vmatprep.subr.bf16.mxu0 %v7250_v2  ;;  %v5507_v2 = vmov 0  }
 0x20f   : > { %5384 = vset.pattern.permute.xlu1 %v5507_v2  ;;  %5383 = vset.pattern.permute.xlu0 %v5507_v2 }
 0x211   : > { %5038 = vmatpush3.bf16.msra.mxu0 %v7251_v45  ;;  %v7339_v45 = vld [vmem:[#allocation17_spill] sm:$0xff] }
 0x212   : > { %5040 = vmatprep.subr.bf16.mxu0 %v7252_v55  ;;  %v7334_v55 = vld [vmem:[#allocation12_spill] sm:$0xff] }
 0x215   : > { %5042 = vmatpush3.bf16.msra.mxu0 %v5943_v60  ;;  %v7336_v60 = vld [vmem:[#allocation14_spill] sm:$0xff] }
 0x216   : > { %5076 = vmatprep.subr.bf16.mxu0 %v6553_v9  ;;  %v7340_v9 = vld [vmem:[#allocation18_spill] sm:$0xff] }
 0x218   : > { %2135 = vmatmul.mubr.f32.vlgmr.msra.gmra.mrb[8].mxu0 %v2134_v58  ;;  %v5510_v58 = vmov 0.0  }
 0x219   : > { %5078 = vmatpush3.bf16.msra.mxu0 %v6560_v8  ;;  %2502 = vmatprep.mubr.f32.mxu0 %v7329_v4  ;;  %v7341_v8 = vld [vmem:[#allocation19_spill] sm:$0xff] }
 0x21a   : > { %5080 = vmatprep.subr.bf16.mxu0 %v6566_v27  ;;  %v7342_v27 = vld [vmem:[#allocation44_spill] sm:$0xff]  ;;  %3606 = vmatprep.mubr.f32.mxu1 %v5510_v58 }
 0x21d   : > { %5082 = vmatpush3.bf16.msra.mxu0 %v6573_v59  ;;  %v7343_v59 = vld [vmem:[#allocation42_spill] sm:$0xff] }
 0x21e   : > { %5084 = vmatprep.subr.bf16.mxu0 %v7333_v52 }
 0x221   : > { %5086 = vmatpush3.bf16.msra.mxu0 %v7334_v55 }
 0x222   : > { %5088 = vmatprep.subr.bf16.mxu0 %v7335_v16  ;;  %v6846_v16 = vsub.f32 %v332_v42, %v2927_v30 }
 0x225   : > { %5090 = vmatpush3.bf16.msra.mxu0 %v7336_v60  ;;  %v6848_v60 = vsub.f32 %v333_v20, %v2930_v40 }
 0x226   : > { %5092 = vmatprep.subr.bf16.mxu0 %v7337_v33 }
 0x228   : > { %v4378_v18 = vpop.f32.mrb[6].mxu1 }
 0x229   : > { %v4379_v48 = vpop.f32.mrb[7].mxu1  ;;  %5094 = vmatpush3.bf16.msra.mxu0 %v7338_v6 }
 0x22a   : > { %v6791_v26 = vadd.f32 %v4379_v48, %v4378_v18  ;;  %5096 = vmatprep.subr.bf16.mxu0 %v7339_v45 }
 0x22d   : > { %5098 = vmatpush3.bf16.msra.mxu0 %v7340_v9 }
 0x22e   : > { %5100 = vmatprep.subr.bf16.mxu0 %v7341_v8 }
 0x231   : > { %5102 = vmatpush3.bf16.msra.mxu0 %v7342_v27 }
 0x232   : > { %5104 = vmatprep.subr.bf16.mxu0 %v7343_v59  ;;  %v3012_v59 = vand.u32 4294901760, %v6846_v16 }
 0x235   : > { %5106 = vmatpush3.bf16.msra.mxu0 %v6635_v41 }
 0x236   : > { %5140 = vmatprep.subr.bf16.mxu0 %v6642_v36 }
 0x238   : > { %2505 = vmatmul.mubr.f32.vlgmr.msra.gmra.mrb[10].mxu0 %v6493_v0 }
 0x239   : > { %5142 = vmatpush3.bf16.msra.mxu0 %v6649_v63  ;;  %2779 = vmatprep.mubr.f32.mxu0 %v7344_v35 }
 0x23a   : > { %5144 = vmatprep.subr.bf16.mxu0 %v6656_v56  ;;  %v7345_v56 = vld [vmem:[#allocation10_spill] sm:$0xff] }
 0x23d   : > { %5146 = vmatpush3.bf16.msra.mxu0 %v6665_v61 }
 0x23e   : > { %5148 = vmatprep.subr.bf16.mxu0 %v6672_v47 }
 0x241   : > { %5150 = vmatpush3.bf16.msra.mxu0 %v6679_v49 }
 0x242   : > { %5152 = vmatprep.subr.bf16.mxu0 %v6686_v5 }
 0x245   : > { %5154 = vmatpush3.bf16.msra.mxu0 %v6693_v10 }
 0x246   : > { %5156 = vmatprep.subr.bf16.mxu0 %v6700_v57 }
 0x248   : > { %v4448_v36 = vpop.f32.mrb[8].mxu1 }
 0x249   : > { %v4449_v0 = vpop.f32.mrb[9].mxu1  ;;  %5158 = vmatpush3.bf16.msra.mxu0 %v6707_v39 }
 0x24a   : > { %v6811_v63 = vadd.f32 %v4449_v0, %v4448_v36  ;;  %5160 = vmatprep.subr.bf16.mxu0 %v6714_v25  ;;  %v3013_v36 = vsub.f32 %v6846_v16, %v3012_v59  ;;  %v3019_v0 = vand.u32 4294901760, %v6848_v60 }
 0x24d   : > { %5162 = vmatpush3.bf16.msra.mxu0 %v6721_v46 }
 0x24e   : > { %5164 = vmatprep.subr.bf16.mxu0 %v6728_v34 }
 0x251   : > { %5166 = vmatpush3.bf16.msra.mxu0 %v6737_v37 }
 0x252   : > { %5168 = vmatprep.subr.bf16.mxu0 %v6744_v23 }
 0x255   : > { %5170 = vmatpush3.bf16.msra.mxu0 %v6751_v53 }
 0x256   : > { %5203 = vmatprep.subr.bf16.mxu0 %v5508_v54 }
 0x258   : > { %2781 = vmatmul.mubr.f32.vlgmr.msra.gmra.mrb[12].mxu0 %v7345_v56 }
 0x259   : > { %4713 = vmatprep.mubr.msk.f32.mxu0 %vm5509_vm9, %v5510_v58 }
 0x268   : > { %v4518_v41 = vpop.f32.mrb[10].mxu1 }
 0x269   : > { %v4519_v61 = vpop.f32.mrb[11].mxu1 }
 0x26a   : > { %v6820_v47 = vadd.f32 %v4519_v61, %v4518_v41  ;;  %v3014_v61 = vand.u32 4294901760, %v3013_v36  ;;  %v323_v36 = vld [vmem:[%s7018_s3] sm:$0xff] }
 0x288   : > { %v4588_v49 = vpop.f32.mrb[12].mxu1 }
 0x289   : > { %v4589_v5 = vpop.f32.mrb[13].mxu1 }
 0x28a   : > { %v6822_v10 = vadd.f32 %v4589_v5, %v4588_v49  ;;  %v3020_v49 = vsub.f32 %v6848_v60, %v3019_v0 }
 0x28b   : > { %v4701_v29 = vpop.f32.mrb[0].mxu0 }
 0x28c   : > { %v4112_v57 = vmul.f32 -1.442695, %v4701_v29  ;;  %v1080_v12 = vpop.f32.mrb[1].mxu0 }
 0x28d   : > { %v4111_v13 = vmul.f32 -1.442695, %v1080_v12 }
 0x28e   : > { %5393 = vpow2.f32 %v4112_v57 }
 0x28f   : > { %5395 = vpow2.f32 %v4111_v13  ;;  %v4704_v39 = vpop.f32.mrb[2].mxu0 }
 0x290   : > { %v4114_v17 = vmul.f32 -1.442695, %v4704_v39  ;;  %v1092_v15 = vpop.f32.mrb[3].mxu0 }
 0x291   : > { %v4113_v25 = vmul.f32 -1.442695, %v1092_v15 }
 0x292   : > { %5397 = vpow2.f32 %v4114_v17 }
 0x293   : > { %5399 = vpow2.f32 %v4113_v25 }
 0x298   : > { %v5394_v50 = vpop.eup %5393 }
 0x299   : > { %v5396_v19 = vpop.eup %5395  ;;  %v1115_v28 = vadd.f32 1.0, %v5394_v50 }
 0x29a   : > { %v1114_v32 = vadd.f32 1.0, %v5396_v19 }
 0x29b   : > { %5401 = vrcp.f32 %v1115_v28 }
 0x29c   : > { %v5398_v46 = vpop.eup %5397  ;;  %5403 = vrcp.f32 %v1114_v32 }
 0x29d   : > { %v5400_v14 = vpop.eup %5399  ;;  %v1117_v22 = vadd.f32 1.0, %v5398_v46 }
 0x29e   : > { %v1116_v11 = vadd.f32 1.0, %v5400_v14 }
 0x2a0   : > { %5405 = vrcp.f32 %v1116_v11 }
 0x2a1   : > { %5407 = vrcp.f32 %v1117_v22 }
 0x2a5   : > { %v5402_v34 = vpop.eup %5401 }
 0x2a6   : > { %v5404_v51 = vpop.eup %5403  ;;  %v1127_v38 = vmul.f32 0.33333334, %v5402_v34  ;;  %v339_v34 = vld [vmem:[%s7021_s6] sm:$0x1f] }
 0x2a7   : > { %v1126_v37 = vmul.f32 0.33333334, %v5404_v51  ;;  %v2891_v51 = vrot.slane %v339_v34, 2 }
 0x2a8   : > { %3968 = vperm.xlu1 %5384, %v1127_v38  }
 0x2a9   : > { %3963 = vperm.xlu0 %5383, %v1126_v37  }
 0x2aa   : > { %v5406_v7 = vpop.eup %5405 }
 0x2ab   : > { %v4273_v43 = vpop.f32.mrb[4].mxu0  ;;  %v1128_v23 = vmul.f32 0.33333334, %v5406_v7  ;;  %v5408_v44 = vpop.eup %5407 }
 0x2ac   : > { %v4274_v31 = vpop.f32.mrb[5].mxu0  ;;  %v1129_v62 = vmul.f32 0.33333334, %v5408_v44 }
 0x2ad   : > { %v4275_v53 = vadd.f32 %v4274_v31, %v4273_v43  ;;  %3973 = vperm.xlu1 %5384, %v1128_v23   ;;  %v2899_v31 = vrot.slane %v339_v34, 4 }
 0x2af   : > { %v1645_v4 = vadd.f32 %v4275_v53, %v6730_v1  ;;  %v2924_v1 = vand.u32 4294901760, %v331_v24 }
 0x2b1   : > { %3978 = vperm.xlu1 %5384, %v1129_v62   ;;  %v1753_v3 = vadd.f32 %v6769_v21, %v1645_v4  ;;  %v334_v21 = vld [vmem:[%s7019_s4 + $0x18] sm:$0xff]  ;;  %v6842_v55 = vpack.c.bf16 %v2927_v30, %v2924_v1  ;;  %v6844_v2 = vsub.f32 %v331_v24, %v2924_v1 }
 0x2b2   : > { %v2933_v52 = vand.u32 4294901760, %v334_v21 }
 0x2b3   : > { %5205 = vmatpush3.bf16.msra.mxu0 %v6842_v55  ;;  %v3005_v27 = vand.u32 4294901760, %v6844_v2  ;;  %v5216_v13 = vpack.c.bf16 %v6846_v16, %v6844_v2 }
 0x2b4   : > { %v6850_v33 = vsub.f32 %v334_v21, %v2933_v52  ;;  %v6853_v18 = vpack.c.bf16 %v2933_v52, %v2930_v40  ;;  %5206 = vmatprep.subr.bf16.mxu0 %v5508_v54  ;;  %v7346_v21 = vld [vmem:[#allocation46_spill] sm:$0xff] }
 0x2b5   : > { %v3006_v35 = vsub.f32 %v6844_v2, %v3005_v27  ;;  %v5228_v19 = vpack.c.bf16 %v3012_v59, %v3005_v27  ;;  %v324_v27 = vld [vmem:[%s7018_s3 + $0x8] sm:$0xff]  ;;  %v326_v59 = vld [vmem:[%s7018_s3 + $0x18] sm:$0xff] }
 0x2b6   : > { %v3026_v56 = vand.u32 4294901760, %v6850_v33  ;;  %v5219_v39 = vpack.c.bf16 %v6850_v33, %v6848_v60 }
 0x2b7   : > { %5208 = vmatpush3.bf16.msra.mxu0 %v6853_v18  ;;  %v3007_v41 = vand.u32 4294901760, %v3006_v35  ;;  %v3418_v35 = vand.u32 4294901760, %v324_v27 }
 0x2b8   : > { %5209 = vmatprep.subr.bf16.mxu0 %v5508_v54  ;;  %v3027_v5 = vsub.f32 %v6850_v33, %v3026_v56  ;;  %v5231_v28 = vpack.c.bf16 %v3026_v56, %v3019_v0 }
 0x2b9   : > { %v5210_v29 = vpack.c.bf16 %v3014_v61, %v3007_v41  ;;  %v3503_v56 = vsub.f32 %v324_v27, %v3418_v35 }
 0x2ba   : > { %v3028_v57 = vand.u32 4294901760, %v3027_v5  ;;  %v328_v5 = vld [vmem:[%s7018_s3 + $0x28] sm:$0xff] }
 0x2cb   : > { %v4343_v48 = vpop.f32.mrb[6].mxu0 }
 0x2cc   : > { %v4344_v6 = vpop.f32.mrb[7].mxu0 }
 0x2cd   : > { %v4345_v45 = vadd.f32 %v4344_v6, %v4343_v48 }
 0x2cf   : > { %v1921_v9 = vadd.f32 %v4345_v45, %v1753_v3 }
 0x2d1   : > { %v2025_v8 = vadd.f32 %v6791_v26, %v1921_v9  ;;  %v3021_v26 = vand.u32 4294901760, %v3020_v49 }
 0x2d3   : > { %v5213_v12 = vpack.c.bf16 %v3028_v57, %v3021_v26  ;;  %v2893_v38 = vmul.f32 %v2891_v51, %v2025_v8  ;;  %v3504_v26 = vand.u32 4294901760, %v3503_v56 }
 0x2d5   : > { %v2898_v23 = vmul.f32 %v2893_v38, %v2893_v38  ;;  %v2894_v40 = vadd.f32 %v2893_v38, %v7346_v21 }
 0x2d7   : > { %v2901_v62 = vmul.f32 %v2899_v31, %v2898_v23  ;;  %v2911_v16 = vmul.f32 %v2894_v40, %v339_v34 }
 0x2eb   : > { %v4413_v17 = vpop.f32.mrb[8].mxu0 }
 0x2ec   : > { %v4414_v15 = vpop.f32.mrb[9].mxu0 }
 0x2ed   : > { %v4415_v25 = vadd.f32 %v4414_v15, %v4413_v17  ;;  %v329_v17 = vld [vmem:[%s7018_s3 + $0x30] sm:$0xff] }
 0x2ef   : > { %v2369_v50 = vadd.f32 %v6811_v63, %v4415_v25  ;;  %v2895_v63 = vrot.slane %v339_v34, 3 }
 0x30b   : > { %v4483_v32 = vpop.f32.mrb[10].mxu0 }
 0x30c   : > { %v4484_v46 = vpop.f32.mrb[11].mxu0 }
 0x30d   : > { %v4485_v14 = vadd.f32 %v4484_v46, %v4483_v32 }
 0x30f   : > { %v2507_v22 = vadd.f32 %v4485_v14, %v2369_v50 }
 0x311   : > { %v2615_v11 = vadd.f32 %v6820_v47, %v2507_v22 }
 0x32b   : > { %v4553_v37 = vpop.f32.mrb[12].mxu0 }
 0x32c   : > { %v4554_v7 = vpop.f32.mrb[13].mxu0 }
 0x32d   : > { %v4555_v43 = vadd.f32 %v4554_v7, %v4553_v37 }
 0x32f   : > { %v2783_v44 = vadd.f32 %v4555_v43, %v2615_v11 }
 0x331   : > { %v2887_v53 = vadd.f32 %v6822_v10, %v2783_v44 }
 0x333   : > { %v2897_v4 = vmul.f32 %v2895_v63, %v2887_v53 }
 0x335   : > { %v2902_v3 = vsub.f32 %v2897_v4, %v2901_v62 }
 0x337   : > { %v2903_v24 = vmax.f32 %v2902_v3, 0.0 }
 0x339   : > { %5409 = vrsqrt.f32 %v2903_v24  ;;  %vm2906_vm10 = vcmp.eq.f32.partialorder %v2903_v24, inf  ;;  %v2909_v20 = vand.u32 2147483648, %v2903_v24  ;;  %vm2908_vm11 = vcmp.eq.f32.partialorder %v2903_v24, 0.0 }
 0x343   : > { %v5410_v47 = vpop.eup %5409 }
 0x344   : > { %v2905_v42 = vmul.f32 %v5410_v47, %v2903_v24 }
 0x346   : > { %v2907_v1 = vsel %vm2906_vm10, %v2903_v24, %v2905_v42 }
 0x347   : > { %v2910_v30 = vsel %vm2908_vm11, %v2909_v20, %v2907_v1 }
 0x348   : > { %v2913_v52 = vrot.slane %v2910_v30, 7 }
 0x34a   : > { %v2915_v2 = vmul.f32 %v2913_v52, %v339_v34 }
 0x34c   : > { %v2917_v60 = vrot.slane %v2915_v2, 1 }
 0x34e   : > { %v2919_v33 = vadd.f32 %v2917_v60, %v2911_v16 }
 0x350   : > { %v2921_v10 = vsel %vm475_vm0, %v2919_v33, 0 }
 0x351   : > { %v2992_v48 = vand.u32 4294901760, %v2921_v10 }
 0x353   : > { %v2993_v6 = vsub.f32 %v2921_v10, %v2992_v48 }
 0x355   : > { %v2994_v45 = vand.u32 4294901760, %v2993_v6 }
 0x357   : > { %v2995_v9 = vsub.f32 %v2993_v6, %v2994_v45 }
 0x359   : > { %v2996_v8 = vand.u32 4294901760, %v2995_v9 }
 0x35b   : > { %4714 = vmatmul.mubr.f32.vlgmr.msra.gmra.mrb[14].mxu0 %v2996_v8 }
 0x35c   : > { %5211 = vmatpush3.bf16.msra.mxu0 %v5210_v29  ;;  %4724 = vmatprep.mubr.msk.f32.mxu0 %vm5509_vm9, %v5510_v58  ;;  %v330_v29 = vld [vmem:[%s7018_s3 + $0x38] sm:$0xff] }
 0x35d   : > { %5212 = vmatprep.subr.bf16.mxu0 %v5508_v54 }
 0x360   : > { %5214 = vmatpush3.bf16.msra.mxu0 %v5213_v12  ;;  %v3426_v12 = vand.u32 4294901760, %v328_v5 }
 0x361   : > { %5215 = vmatprep.subr.bf16.mxu0 %v5508_v54 }
 0x362   : > { %v3527_v46 = vsub.f32 %v328_v5, %v3426_v12 }
 0x363   : > { %4725 = vmatmul.mubr.f32.vlgmr.msra.gmra.mrb[14].mxu0 %v2992_v48 }
 0x364   : > { %5217 = vmatpush3.bf16.msra.mxu0 %v5216_v13  ;;  %4735 = vmatprep.mubr.msk.f32.mxu0 %vm5509_vm9, %v5510_v58  ;;  %v3430_v13 = vand.u32 4294901760, %v330_v29  ;;  %v3528_v7 = vand.u32 4294901760, %v3527_v46 }
 0x365   : > { %5218 = vmatprep.subr.bf16.mxu0 %v5508_v54 }
 0x366   : > { %v3539_v14 = vsub.f32 %v330_v29, %v3430_v13  ;;  %v3529_v4 = vsub.f32 %v3527_v46, %v3528_v7  ;;  %v5243_v33 = vpack.c.bf16 %v3430_v13, %v3426_v12  ;;  %v3981_v12 = vlaneseq  ;;  %v3969_v13 = vpop.permute.xlu1 %3968 }
 0x368   : > { %5220 = vmatpush3.bf16.msra.mxu0 %v5219_v39  ;;  %v327_v39 = vld [vmem:[%s7018_s3 + $0x20] sm:$0xff]  ;;  %v3540_v43 = vand.u32 4294901760, %v3539_v14  ;;  %v3530_v20 = vand.u32 4294901760, %v3529_v4  ;;  %v5259_v2 = vpack.c.bf16 %v3539_v14, %v3527_v46 }
 0x369   : > { %5221 = vmatprep.subr.bf16.mxu0 %v5508_v54  ;;  %v3428_v50 = vand.u32 4294901760, %v327_v39 }
 0x36a   : > { %v3541_v62 = vsub.f32 %v3539_v14, %v3540_v43  ;;  %v5275_v8 = vpack.c.bf16 %v3540_v43, %v3528_v7 }
 0x36b   : > { %4736 = vmatmul.mubr.f32.vlgmr.msra.gmra.mrb[14].mxu0 %v2993_v6  ;;  %v3533_v34 = vsub.f32 %v327_v39, %v3428_v50  ;;  %v3982_v39 = vshrl.u32 %v3981_v12, 7 }
 0x36c   : > { %5223 = vmatpush3.bf16.msra.mxu0 %v6842_v55  ;;  %4746 = vmatprep.mubr.msk.f32.mxu0 %vm5509_vm9, %v5510_v58  ;;  %v3542_v1 = vand.u32 4294901760, %v3541_v62  ;;  %v5418_v62 = vld [vmem:[%s5625_s23 + $0x30] sm:$0xff] }
 0x36d   : > { %5224 = vmatprep.subr.bf16.mxu0 %v5508_v54  ;;  %v3534_v63 = vand.u32 4294901760, %v3533_v34 }
 0x36e   : > { %v5251_v16 = vpack.c.bf16 %v3542_v1, %v3530_v20  ;;  %v5421_v1 = vld [vmem:[%s5625_s23 + $0x28] sm:$0xff] }
 0x36f   : > { %v3535_v24 = vsub.f32 %v3533_v34, %v3534_v63 }
 0x370   : > { %5226 = vmatpush3.bf16.msra.mxu0 %v6853_v18 }
 0x371   : > { %5227 = vmatprep.subr.bf16.mxu0 %v5508_v54  ;;  %v3536_v21 = vand.u32 4294901760, %v3535_v24  ;;  %v5419_v24 = vld [vmem:[%s5625_s23 + $0x8] sm:$0xff] }
 0x373   : > { %4747 = vmatmul.mubr.f32.vlgmr.msra.gmra.mrb[14].mxu0 %v2994_v45 }
 0x374   : > { %5229 = vmatpush3.bf16.msra.mxu0 %v5228_v19  ;;  %4757 = vmatprep.mubr.msk.f32.mxu0 %vm5509_vm9, %v5510_v58  ;;  %v3432_v19 = vand.u32 4294901760, %v329_v17 }
 0x375   : > { %5230 = vmatprep.subr.bf16.mxu0 %v5508_v54 }
 0x376   : > { %v3545_v51 = vsub.f32 %v329_v17, %v3432_v19  ;;  %v5245_v6 = vpack.c.bf16 %v3432_v19, %v3428_v50  ;;  %v3974_v17 = vpop.permute.xlu1 %3973 }
 0x378   : > { %5232 = vmatpush3.bf16.msra.mxu0 %v5231_v28  ;;  %v3505_v28 = vsub.f32 %v3503_v56, %v3504_v26  ;;  %v3546_v31 = vand.u32 4294901760, %v3545_v51  ;;  %v5261_v10 = vpack.c.bf16 %v3545_v51, %v3533_v34 }
 0x379   : > { %5233 = vmatprep.subr.bf16.mxu0 %v5508_v54 }
 0x37a   : > { %v3506_v38 = vand.u32 4294901760, %v3505_v28  ;;  %v3547_v47 = vsub.f32 %v3545_v51, %v3546_v31  ;;  %v5277_v27 = vpack.c.bf16 %v3546_v31, %v3534_v63  ;;  %v3979_v46 = vpop.permute.xlu1 %3978  ;;  %v5416_v63 = vld [vmem:[%s5625_s23 + $0x10] sm:$0xff] }
 0x37b   : > { %4758 = vmatmul.mubr.f32.vlgmr.msra.gmra.mrb[14].mxu0 %v2992_v48 }
 0x37c   : > { %5235 = vmatpush3.bf16.msra.mxu0 %v6842_v55  ;;  %4768 = vmatprep.mubr.msk.f32.mxu0 %vm5509_vm9, %v5510_v58  ;;  %v3422_v55 = vand.u32 4294901760, %v326_v59  ;;  %v3548_v40 = vand.u32 4294901760, %v3547_v47 }
 0x37d   : > { %5236 = vmatprep.subr.bf16.mxu0 %v5508_v54  ;;  %v325_v54 = vld [vmem:[%s7018_s3 + $0x10] sm:$0xff] }
 0x37e   : > { %v3424_v0 = vand.u32 4294901760, %v325_v54  ;;  %v3515_v41 = vsub.f32 %v326_v59, %v3422_v55  ;;  %v5239_v42 = vpack.c.bf16 %v3422_v55, %v3418_v35 }
 0x380   : > { %5238 = vmatpush3.bf16.msra.mxu0 %v6853_v18  ;;  %v3420_v18 = vand.u32 4294901760, %v323_v36  ;;  %v6917_v49 = vsub.f32 %v325_v54, %v3424_v0  ;;  %v3516_v57 = vand.u32 4294901760, %v3515_v41  ;;  %v5255_v60 = vpack.c.bf16 %v3515_v41, %v3503_v56 }
 0x381   : > { %5240 = vmatprep.subr.bf16.mxu0 %v5239_v42 }
 0x382   : > { %v6915_v61 = vsub.f32 %v323_v36, %v3420_v18  ;;  %v3522_v25 = vand.u32 4294901760, %v6917_v49  ;;  %v3517_v32 = vsub.f32 %v3515_v41, %v3516_v57  ;;  %v5241_v52 = vpack.c.bf16 %v3424_v0, %v3420_v18 }
 0x383   : > { %4769 = vmatmul.mubr.f32.vlgmr.msra.gmra.mrb[14].mxu0 %v2992_v48  ;;  %v5253_v48 = vpack.c.bf16 %v3548_v40, %v3536_v21  ;;  %v5271_v45 = vpack.c.bf16 %v3516_v57, %v3504_v26  ;;  %v5422_v21 = vld [vmem:[%s5625_s23 + $0x38] sm:$0xff] }
 0x384   : > { %3490 = vmatprep.mubr.f32.mxu0 %v5510_v58  ;;  %v3510_v15 = vand.u32 4294901760, %v6915_v61  ;;  %v3523_v11 = vsub.f32 %v6917_v49, %v3522_v25  ;;  %v3518_v37 = vand.u32 4294901760, %v3517_v32  ;;  %v5257_v30 = vpack.c.bf16 %v6917_v49, %v6915_v61  ;;  %5242 = vmatpush1.bf16.msra.mxu0 %v5241_v52  ;;  %v3964_v32 = vpop.permute.xlu0 %3963 }
 0x385   : > { %5244 = vmatprep.subr.bf16.mxu0 %v5243_v33 }
 0x386   : > { %v3511_v22 = vsub.f32 %v6915_v61, %v3510_v15  ;;  %v3524_v44 = vand.u32 4294901760, %v3523_v11  ;;  %v5247_v53 = vpack.c.bf16 %v3518_v37, %v3506_v38  ;;  %v5273_v9 = vpack.c.bf16 %v3522_v25, %v3510_v15 }
 0x387   : > { %v3983_v15 = vsub.s32 0, %v3982_v39 }
 0x388   : > { %v3512_v23 = vand.u32 4294901760, %v3511_v22  ;;  %5248 = vmatprep.subr.bf16.mxu1 %v5247_v53  ;;  %5246 = vmatpush1.bf16.msra.mxu0 %v5245_v6  ;;  %v5417_v53 = vld [vmem:[%s5625_s23 + $0x20] sm:$0xff] }
 0x38a   : > { %v5249_v3 = vpack.c.bf16 %v3524_v44, %v3512_v23  ;;  %v5415_v23 = vld [vmem:[%s5625_s23] sm:$0xff] }
 0x38c   : > { %5250 = vmatpush1.bf16.msra.mxu1 %v5249_v3 }
 0x38d   : > { %5252 = vmatprep.subr.bf16.mxu1 %v5251_v16 }
 0x390   : > { %5254 = vmatpush1.bf16.msra.mxu1 %v5253_v48 }
 0x391   : > { %5256 = vmatprep.subr.bf16.mxu1 %v5255_v60 }
 0x456   : > { %v3404_v59 = vpop.f32.mrb[14].mxu0 }
 0x457   : > { %v4115_v35 = vmul.f32 -1.442695, %v3404_v59  ;;  %v4770_v55 = vpop.f32.mrb[15].mxu0 }
 0x459   : > { %5411 = vpow2.f32 %v4115_v35 }
 0x463   : > { %v5412_v36 = vpop.eup %5411 }
 0x464   : > { %v3411_v54 = vadd.f32 1.0, %v5412_v36 }
 0x466   : > { %5413 = vrcp.f32 %v3411_v54 }
 0x470   : > { %v5414_v18 = vpop.eup %5413 }
 0x471   : > { %v3414_v0 = vmul.f32 0.33333334, %v5414_v18 }
 0x473   : > { %v3416_v56 = vsel %vm475_vm0, %v3414_v0, 0 }
 0x474   : > { %v3491_v41 = vand.u32 4294901760, %v3416_v56 }
 0x476   : > { %v3492_v61 = vsub.f32 %v3416_v56, %v3491_v41  ;;  %3608 = vmatmul.mubr.f32.vlgmr.msra.gmra.mrb[14].mxu1 %v3491_v41 }
 0x477   : > { %5258 = vmatpush1.bf16.msra.mxu1 %v5257_v30  ;;  %3694 = vmatprep.mubr.f32.mxu1 %v5510_v58 }
 0x478   : > { %5260 = vmatprep.subr.bf16.mxu1 %v5259_v2  ;;  %v3493_v49 = vand.u32 4294901760, %v3492_v61 }
 0x47a   : > { %v3494_v5 = vsub.f32 %v3492_v61, %v3493_v49 }
 0x47b   : > { %5262 = vmatpush1.bf16.msra.mxu1 %v5261_v10 }
 0x47c   : > { %5264 = vmatprep.subr.bf16.mxu1 %v5239_v42  ;;  %v3495_v29 = vand.u32 4294901760, %v3494_v5 }
 0x47e   : > { %3496 = vmatmul.mubr.f32.vlgmr.msra.gmra.mrb[16].mxu0 %v3495_v29  ;;  %3697 = vmatmul.mubr.f32.vlgmr.msra.gmra.mrb[14].mxu1 %v3492_v61 }
 0x47f   : > { %5266 = vmatpush1.bf16.msra.mxu1 %v5241_v52  ;;  %3775 = vmatprep.mubr.f32.mxu1 %v5510_v58 }
 0x480   : > { %5268 = vmatprep.subr.bf16.mxu1 %v5243_v33 }
 0x483   : > { %5270 = vmatpush1.bf16.msra.mxu1 %v5245_v6 }
 0x484   : > { %5272 = vmatprep.subr.bf16.mxu1 %v5271_v45 }
 0x486   : > { %3779 = vmatmul.mubr.f32.vlgmr.msra.gmra.mrb[14].mxu1 %v3493_v49 }
 0x487   : > { %5274 = vmatpush1.bf16.msra.mxu1 %v5273_v9  ;;  %3873 = vmatprep.mubr.f32.mxu1 %v5510_v58 }
 0x488   : > { %5276 = vmatprep.subr.bf16.mxu1 %v5275_v8 }
 0x48b   : > { %5278 = vmatpush1.bf16.msra.mxu1 %v5277_v27 }
 0x48c   : > { %5280 = vmatprep.subr.bf16.mxu1 %v5239_v42  ;;  %v5420_v42 = vld [vmem:[%s5625_s23 + $0x18] sm:$0xff]  ;;  %s5442_s23 = sshll.u32 %s5511_s15, 4  ;;  %s5443_s23 = int_to_ptr.vmem [resolvable:$false] %s5442_s23 }
 0x48d   : > { %s5444_s16 = scalar_lea.vmem %s5443_s23, 2048  ;;  %p5445_p13 = scmp.lt.s32.totalorder %s6958_s29, %s5443_s23 }
 0x48e   : > { %3875 = vmatmul.mubr.f32.vlgmr.msra.gmra.mrb[14].mxu1 %v3491_v41  ;;  %p5446_p0 = scmp.lt.s32.totalorder %s5444_s16, %s5438_s14 }
 0x48f   : > { %5282 = vmatpush1.bf16.msra.mxu1 %v5241_v52  ;;  %3953 = vmatprep.mubr.f32.mxu1 %v5510_v58 }
 0x490   : > { %5284 = vmatprep.subr.bf16.mxu1 %v5243_v33  ;;  %p5447_p1 = por %p5446_p0, %p5445_p13 }
 0x492   : > { %p5448_p2 = pnand %p5447_p1, %p5441_p12 }
 0x493   : > { %5286 = vmatpush1.bf16.msra.mxu1 %v5245_v6 }
 0x496   : > { %3955 = vmatmul.mubr.f32.vlgmr.msra.gmra.mrb[14].mxu1 %v3491_v41 }
 0x551   : > { %v3497_v26 = vpop.f32.mrb[16].mxu0 }
 0x552   : > { %v3499_v57 = vpop.f32.mrb[17].mxu0 }
 0x569   : > { %v3956_v25 = vpop.f32.mrb[14].mxu1 }
 0x56a   : > { %v5287_v50 = vadd.f32 %v3956_v25, %v3497_v26  ;;  %v3958_v19 = vpop.f32.mrb[15].mxu1 }
 0x56b   : > { %v5288_v28 = vadd.f32 %v3958_v19, %v3499_v57 }
 0x56c   : > { %v3984_v58 = vrot.slane %v5287_v50, %v3983_v15 }
 0x56d   : > { %v3988_v14 = vrot.slane %v5288_v28, %v3983_v15 }
 0x56e   : > { %v3989_v22 = vadd.f32 %v3984_v58, %v3964_v32  ;;  %v3991_v11 = vadd.f32 %v3984_v58, %v3969_v13  ;;  %v3993_v34 = vadd.f32 %v3984_v58, %v3974_v17  ;;  %v3995_v51 = vadd.f32 %v3984_v58, %v3979_v46 }
 0x56f   : > { %v3990_v38 = vadd.f32 %v3988_v14, %v3964_v32  ;;  %v3992_v37 = vadd.f32 %v3988_v14, %v3969_v13  ;;  %v3994_v7 = vadd.f32 %v3988_v14, %v3974_v17  ;;  %v3996_v43 = vadd.f32 %v3988_v14, %v3979_v46 }
 0x570   : > { %v3997_v44 = vmul.f32 %v5415_v23, %v3989_v22  ;;  %v3999_v31 = vmul.f32 %v5416_v63, %v3991_v11  ;;  %v4001_v4 = vmul.f32 %v5417_v53, %v3993_v34  ;;  %v4003_v3 = vmul.f32 %v5418_v62, %v3995_v51 }
 0x571   : > { %v3998_v47 = vmul.f32 %v5419_v24, %v3990_v38  ;;  %v4000_v20 = vmul.f32 %v5420_v42, %v3992_v37  ;;  %v4002_v30 = vmul.f32 %v5421_v1, %v3994_v7  ;;  %v4004_v40 = vmul.f32 %v5422_v21, %v3996_v43 }
 0x572   : > { %4005 = vst [vmem:[%s6946_s22] sm:$0xff] %v3997_v44  ;;  %4007 = vst [vmem:[%s6946_s22 + $0x10] sm:$0xff] %v3999_v31 }
 0x573   : > { %4009 = vst [vmem:[%s6946_s22 + $0x20] sm:$0xff] %v4001_v4  ;;  %4011 = vst [vmem:[%s6946_s22 + $0x30] sm:$0xff] %v4003_v3 }
 0x574   : > { %4006 = vst [vmem:[%s6946_s22 + $0x8] sm:$0xff] %v3998_v47  ;;  %4008 = vst [vmem:[%s6946_s22 + $0x18] sm:$0xff] %v4000_v20 }
 0x575   : > { %4010 = vst [vmem:[%s6946_s22 + $0x28] sm:$0xff] %v4002_v30  ;;  %4012 = vst [vmem:[%s6946_s22 + $0x38] sm:$0xff] %v4004_v40 }
 0x576   : > { %5451 = shalt.err (!%p5448_p2)
}
 0x577   : > { %s5452_s17 = scalar_lea.hbm %s6956_s9, 1024  ;;  %s5456_s20 = scalar_lea.hbm %s7022_s7, 2048 }
 0x578   : > { %p5453_p3 = scmp.ne.s32.totalorder %s6956_s9, %s5452_s17  ;;  %p5457_p8 = scmp.lt.u32.totalorder %s6956_s9, %s7022_s7 }
 0x579   : > { %p5458_p11 = scmp.lt.u32.totalorder %s5456_s20, %s5452_s17  ;;  %p5460_p10 = scmp.lt.u32.totalorder %s5452_s17, %s6956_s9 }
 0x57a   : > { %p5454_p4 = pnand %p5453_p3, %p5592_p5 }
 0x57b   : > { %p5459_p9 = por %p5458_p11, %p5457_p8 }
 0x57c   : > { %p5455_p7 = pneg %p5454_p4 }
 0x57d   : > { %p5461_p12 = por %p5460_p10, %p5459_p9 }
 0x57f   : > { %p5462_p13 = pnand %p5461_p12, %p5455_p7 }
 0x581   : > { %5465 = shalt.err (!%p5462_p13)
}
 0x582   : > { %s5512_s28 = smov 256   ;;  %s5513_s8 = smov 16  }
 0x583   : > { %5331 = dma.vmem_to_hbm [thread:$0]  (%p5592_p5), %s6958_s29, 1024, %s6956_s9, %s6974_s13, %s5512_s28, %s5512_s28, %s5513_s8  }
 0x584 PF: > { %p5343_p0 = scmp.ge.s32.totalorder %s5504_s27, 2  ;;  %s4042_s14 = sand.u32 1, %s5492_s24  }
 0x585   : > { %s4043_s15 = scalar_lea.sflag [#allocation3], %s4042_s14 }
 0x586   : > { %p5338_p1 = pnand %p5343_p0, %p5596_p6 }
 0x588   : > { %5487 = dma.done.wait (!%p5338_p1), %s4043_s15, 1024  }
 0x589   : > { %5489 = vsyncadd (!%p5338_p1), %s4043_s15, 4294966272  ;;  %p18_p2 = scmp.ge.s32.totalorder %s5579_s30, 4   ;;  %s7347_s24 = smov %s5496_s25 }
 0x58a   : > { %s7348_s25 = smov %s5500_s26  ;;  %s7349_s26 = smov %s5590_s10 }
 0x58b   : > { %s7350_s27 = smov %s5579_s30  ;;  %20 = sbr.rel (!%p18_p2) target bundleno = 4 (0x4), region = 88 }
 0x592   :  { %4048 = vsyncpa [#allocation3], 1 }
 0x593   :  { %4050 = vsyncpa [#allocation3 + $0x1], 1 }
 0x594   :  { %4051 = vsyncpa [#allocation4], 1 }
 0x595   :  { %4053 = vsyncpa [#allocation4 + $0x1], 1 }

</bundles_post_ra>
